<compile_context>
chip_gen: v6e
topology: v6e:2x2x1
jax: 0.10.0
libtpu: 0.0.40
codegen_flags: <defaults>
</compile_context>

<pallas_src>
import functools

import numpy as np
import jax
import jax.numpy as jnp
from jax.experimental import pallas as pl
from jax.experimental.pallas import tpu as pltpu


_SUBLANE = 8  # f32 sublane tile


# ---------------------------------------------------------------------------
# small static helpers
# ---------------------------------------------------------------------------
def _round_up(x, m):
    return ((x + m - 1) // m) * m


def _pick_nb(n, seg, max_lanes=4096):
    """Largest divisor of the batch whose packed lane range stays modest."""
    nb = 1
    for cand in range(1, n + 1):
        if n % cand == 0 and cand * seg <= max_lanes:
            nb = cand
    return nb


def _interp_matrix_align_corners(n_in, n_out):
    a = np.zeros((n_out, n_in), np.float32)
    if n_in == 1:
        a[:, 0] = 1.0
        return a
    scale = (n_in - 1) / (n_out - 1) if n_out > 1 else 0.0
    for o in range(n_out):
        s = o * scale
        i0 = min(int(np.floor(s)), n_in - 1)
        i1 = min(i0 + 1, n_in - 1)
        f = s - i0
        a[o, i0] += 1.0 - f
        a[o, i1] += f
    return a


def _interp_rows_align_corners(n_in, n_out):
    rows = []
    scale = (n_in - 1) / (n_out - 1) if (n_out > 1 and n_in > 1) else 0.0
    for o in range(n_out):
        s = o * scale
        i0 = min(int(np.floor(s)), n_in - 1)
        i1 = min(i0 + 1, n_in - 1)
        rows.append((i0, i1, float(s - i0)))
    return rows


def _build_mask(h, w, wp, seg, nb):
    # 1.0 at flat positions of a segment that hold valid conv1 outputs (the
    # interior of the (h+2, w+2) padded frame, shifted by wp+1), 0.0 on the
    # halo / flat padding; the zeros emulate conv2's zero padding.
    hp = h + 2
    fl = hp * wp
    m2 = np.zeros((hp, wp), np.float32)
    m2[1:h + 1, 1:w + 1] = 1.0
    segm = np.zeros((seg,), np.float32)
    segm[wp + 1:wp + 1 + fl] = m2.reshape(-1)
    return jnp.asarray(np.tile(segm, nb)[None, :])


# ---------------------------------------------------------------------------
# Fully fused kernel: upsample + pad + concat + (conv3x3+BN+ReLU)*2
# ---------------------------------------------------------------------------
def _up_double_conv_kernel(x1_ref, x2_ref, axw_ref, w1_ref, t1_ref,
                           w2_ref, t2_ref, mask_ref, o_ref,
                           frame_ref, h1_ref, *,
                           nb, c1, c2, hs1, h, w, wp, seg, ext,
                           top, left, uph, upw, interp):
    """One grid step: nb images packed along the lane axis.

    x1_ref   : (nb*hs1*c1, ws1)   f32  x1 rows ordered (image, row, channel)
    x2_ref   : (nb*h*c2,  w)      f32  x2 rows ordered (image, row, channel)
    axw_ref  : (ws1, upw)         f32  width-interp matrix (align_corners=True)
    w1_ref   : (cmid, 9*cin)      bf16 conv1 weights (BN scale folded)
    t1_ref   : (cmid, 1)          f32  conv1 shift (folded BN)
    w2_ref   : (coutp, 9*cmid)    bf16 conv2 weights (BN scale folded)
    t2_ref   : (coutp, 1)         f32  conv2 shift
    mask_ref : (1, nb*seg)        f32  1 on valid conv1 outputs, 0 on halo/pad
    o_ref    : (1, coutp, nb*seg) f32  conv2 output over the padded frames
    frame_ref: (cin,  nb*seg+128) bf16 scratch: flat halo-padded concat frames
    h1_ref   : (cmid, nb*seg+128) bf16 scratch: conv1 activation
    """
    cin = c1 + c2
    cmid = h1_ref.shape[0]
    pk = nb * seg

    # -- reset scratch: halo / inter-row gaps / segment tails must be zero ----
    frame_ref[...] = jnp.zeros_like(frame_ref)
    h1_ref[:, pk:] = jnp.zeros((cmid, h1_ref.shape[1] - pk), h1_ref.dtype)

    # -- bilinear 2x upsample of x1 along W: one small GEMM (no gathers) ------
    xw = jnp.dot(x1_ref[...], axw_ref[...],
                 preferred_element_type=jnp.float32)        # (nb*hs1*c1, upw)

    # -- build the flat zero-halo frames: concat(x2, up(x1)); F.pad fused -----
    for n in range(nb):
        base = n * seg + ext
        for y in range(h):
            x2_row = x2_ref[(n * h + y) * c2:(n * h + y + 1) * c2, :]  # (c2,w)
            ys = y - top                      # source row in the upsampled x1
            if 0 <= ys < uph:
                i0, i1, f = interp[ys]        # static height-interp weights
                r0 = (n * hs1 + i0) * c1
                row0 = xw[r0:r0 + c1, :]
                if f == 0.0:
                    up_row = row0
                else:
                    r1 = (n * hs1 + i1) * c1
                    up_row = (1.0 - f) * row0 + f * xw[r1:r1 + c1, :]
                lo, hi = max(0, left), min(w, left + upw)   # F.pad placement
                pieces = []
                if lo > 0:
                    pieces.append(jnp.zeros((c1, lo), jnp.float32))
                pieces.append(up_row[:, lo - left:hi - left])
                if hi < w:
                    pieces.append(jnp.zeros((c1, w - hi), jnp.float32))
                up_full = (pieces[0] if len(pieces) == 1
                           else jnp.concatenate(pieces, axis=1))
            else:
                up_full = jnp.zeros((c1, w), jnp.float32)
            # torch.cat([x2, x1], dim=1): x2 channels first
            row = jnp.concatenate([x2_row, up_full], axis=0)        # (cin, w)
            col = base + (y + 1) * wp + 1
            frame_ref[:, col:col + w] = row.astype(frame_ref.dtype)

    # -- conv3x3 as K-split GEMM over lane-shifted taps of the flat frame -----
    offs = [dy * wp + dx for dy in range(3) for dx in range(3)]

    def conv3x3(src_ref, w_ref, kc):
        acc = None
        for g in range(3):        # split K into 3 dy-groups, f32 accumulation
            taps = jnp.concatenate(
                [src_ref[:, o:o + pk] for o in offs[3 * g:3 * g + 3]], axis=0)
            part = jnp.dot(w_ref[:, 3 * g * kc:3 * (g + 1) * kc], taps,
                           preferred_element_type=jnp.float32)
            acc = part if acc is None else acc + part
        return acc

    # conv1 + folded BN + ReLU; the mask re-creates conv2's zero padding
    acc1 = conv3x3(frame_ref, w1_ref, cin)                    # (cmid, pk) f32
    h1 = jnp.maximum(acc1 + t1_ref[...], 0.0) * mask_ref[...]
    h1_ref[:, :pk] = h1.astype(h1_ref.dtype)

    # conv2 + folded BN + ReLU on the VMEM-resident activation (never HBM)
    acc2 = conv3x3(h1_ref, w2_ref, cmid)                      # (coutp, pk) f32
    o_ref[0] = jnp.maximum(acc2 + t2_ref[...], 0.0).astype(o_ref.dtype)


# ---------------------------------------------------------------------------
# Parameters (deterministic synthetic init; BN folded into weights + shift)
# ---------------------------------------------------------------------------
def init_params(key, in_ch, out_ch):
    # TODO(synk): BatchNorm is folded in eval (running-stats) mode;
    # training-mode batch statistics are not reproduced.
    eps = 1e-5
    cmid = _round_up(out_ch, _SUBLANE)
    coutp = _round_up(out_ch, _SUBLANE)
    keys = jax.random.split(key, 4)

    def conv_params(k, cin, cout):
        kw, kb = jax.random.split(k)
        w = 0.1 * jax.random.normal(kw, (cout, cin, 3, 3), jnp.float32)  # OIHW
        b = 0.1 * jax.random.normal(kb, (cout,), jnp.float32)
        return w, b

    def bn_params(k, c):
        k1, k2, k3, k4 = jax.random.split(k, 4)
        gamma = 1.0 + 0.1 * jax.random.normal(k1, (c,), jnp.float32)
        beta = 0.1 * jax.random.normal(k2, (c,), jnp.float32)
        mean = 0.1 * jax.random.normal(k3, (c,), jnp.float32)
        var = 1.0 + jnp.abs(jax.random.normal(k4, (c,), jnp.float32))
        return gamma, beta, mean, var

    def fold(w, b, gamma, beta, mean, var):
        # fold the BN scale into the conv weight -> kernel epilogue is add+ReLU
        s = gamma / jnp.sqrt(var + eps)
        w_f = w * s[:, None, None, None]                 # (O, I, 3, 3)
        shift = (beta + (b - mean) * s).reshape(-1, 1)   # (O, 1)
        # (O, I, ky, kx) -> (O, ky, kx, I): GEMM column = (ky*3+kx)*I + i,
        # matching the tap-major / channel-minor row order built in the kernel.
        return jnp.transpose(w_f, (0, 2, 3, 1)), shift

    w1, b1 = conv_params(keys[0], in_ch, out_ch)
    w1m, t1 = fold(w1, b1, *bn_params(keys[1], out_ch))
    w1m = w1m.reshape(out_ch, 9 * in_ch)
    w1m = jnp.pad(w1m, ((0, cmid - out_ch), (0, 0)))   # pad GEMM rows to 8
    t1 = jnp.pad(t1, ((0, cmid - out_ch), (0, 0)))

    w2, b2 = conv_params(keys[2], out_ch, out_ch)
    w2m, t2 = fold(w2, b2, *bn_params(keys[3], out_ch))        # (O,3,3,out_ch)
    w2m = jnp.pad(w2m, ((0, 0), (0, 0), (0, 0), (0, cmid - out_ch)))  # pad K
    w2m = w2m.reshape(out_ch, 9 * cmid)
    w2m = jnp.pad(w2m, ((0, coutp - out_ch), (0, 0)))  # pad output rows to 8
    t2 = jnp.pad(t2, ((0, coutp - out_ch), (0, 0)))

    return dict(w1=w1m.astype(jnp.bfloat16), t1=t1,
                w2=w2m.astype(jnp.bfloat16), t2=t2, out_ch=out_ch)


# ---------------------------------------------------------------------------
# `up.forward(x1, x2)` — NCHW in, NCHW out (like PyTorch)
# ---------------------------------------------------------------------------
def up_forward(x1, x2, params):
    n, c1, hs1, ws1 = x1.shape
    n2, c2, h, w = x2.shape
    assert n == n2
    uph, upw = 2 * hs1, 2 * ws1                      # upsampled x1 size
    dy, dx = h - uph, w - upw                        # F.pad amounts (can be <0)
    top, left = dy // 2, dx // 2
    hp, wp = h + 2, w + 2
    fl = hp * wp
    ext = 2 * (wp + 1)                               # frame offset in a segment
    seg = _round_up(fl + ext, 128)                   # per-image lane segment
    nb = _pick_nb(n, seg)                            # images packed per step
    pk = nb * seg

    cmid = params["w1"].shape[0]
    coutp = params["w2"].shape[0]
    cin = c1 + c2
    assert params["w1"].shape[1] == 9 * cin

    # static interp tables (align_corners=True) and the conv1 validity mask
    axw = jnp.asarray(_interp_matrix_align_corners(ws1, upw).T)   # (ws1, upw)
    interp = tuple(_interp_rows_align_corners(hs1, uph))
    mask = _build_mask(h, w, wp, seg, nb)                          # (1, pk)

    # tiny layout plumbing so the kernel only needs 2-D refs / static slices:
    # rows ordered (image, spatial row, channel), width on the lane axis.
    x1r = jnp.transpose(x1, (0, 2, 1, 3)).reshape(n * hs1 * c1, ws1)
    x2r = jnp.transpose(x2, (0, 2, 1, 3)).reshape(n * h * c2, w)

    kern = functools.partial(
        _up_double_conv_kernel, nb=nb, c1=c1, c2=c2, hs1=hs1, h=h, w=w,
        wp=wp, seg=seg, ext=ext, top=top, left=left, uph=uph, upw=upw,
        interp=interp)

    out = pl.pallas_call(
        kern,
        out_shape=jax.ShapeDtypeStruct((n // nb, coutp, pk), jnp.float32),
        grid_spec=pltpu.PrefetchScalarGridSpec(
            num_scalar_prefetch=0,
            grid=(n // nb,),
            in_specs=[
                pl.BlockSpec((nb * hs1 * c1, ws1), lambda i: (i, 0)),
                pl.BlockSpec((nb * h * c2, w), lambda i: (i, 0)),
                pl.BlockSpec(axw.shape, lambda i: (0, 0)),
                pl.BlockSpec(params["w1"].shape, lambda i: (0, 0)),
                pl.BlockSpec(params["t1"].shape, lambda i: (0, 0)),
                pl.BlockSpec(params["w2"].shape, lambda i: (0, 0)),
                pl.BlockSpec(params["t2"].shape, lambda i: (0, 0)),
                pl.BlockSpec((1, pk), lambda i: (0, 0)),
            ],
            out_specs=pl.BlockSpec((1, coutp, pk), lambda i: (i, 0, 0)),
            scratch_shapes=[
                pltpu.VMEM((cin, pk + 128), jnp.bfloat16),   # flat frames
                pltpu.VMEM((cmid, pk + 128), jnp.bfloat16),  # conv1 activation
            ],
        ),
        compiler_params=pltpu.CompilerParams(
            dimension_semantics=("parallel",)),
    )(x1r, x2r, axw, params["w1"], params["t1"],
      params["w2"], params["t2"], mask)

    # un-pack the lane-packed batch, drop padded channels, crop the halo
    out = out.reshape(n // nb, coutp, nb, seg)
    out = jnp.transpose(out, (0, 2, 1, 3)).reshape(n, coutp, seg)
    out = out[:, :params["out_ch"], :fl].reshape(n, params["out_ch"], hp, wp)
    return out[:, :, 1:h + 1, 1:w + 1]


if __name__ == "__main__":
    key = jax.random.PRNGKey(0)
    k1, k2, kp = jax.random.split(key, 3)

    in_ch, out_ch = 8, 4                             # up(in_ch=8, out_ch=4)
    # x1: coarse feature map (gets upsampled 2x); x2: skip connection (NCHW).
    x1 = jax.random.normal(k1, (2, in_ch // 2, 8, 8), jnp.float32)
    x2 = jax.random.normal(k2, (2, in_ch // 2, 16, 16), jnp.float32)

    params = init_params(kp, in_ch, out_ch)

    fwd = jax.jit(functools.partial(up_forward, params=params))
    y = fwd(x1, x2)
    jax.block_until_ready(y)
    assert y.shape == (2, out_ch, 16, 16), y.shape
    assert bool(jnp.all(jnp.isfinite(y)))
    print("KERNEL_OK")
</pallas_src>

<mosaic_0001>
module attributes {stable_mosaic.version = 11 : i64} {
  func.func @_up_double_conv_kernel(%arg0: i32, %arg1: memref<64x8xf32, #tpu.memory_space<vmem>>, %arg2: memref<128x16xf32, #tpu.memory_space<vmem>>, %arg3: memref<8x16xf32, #tpu.memory_space<vmem>>, %arg4: memref<8x72xbf16, #tpu.memory_space<vmem>>, %arg5: memref<8x1xf32, #tpu.memory_space<vmem>>, %arg6: memref<8x72xbf16, #tpu.memory_space<vmem>>, %arg7: memref<8x1xf32, #tpu.memory_space<vmem>>, %arg8: memref<1x768xf32, #tpu.memory_space<vmem>>, %arg9: memref<1x8x768xf32, #tpu.memory_space<vmem>>, %arg10: memref<8x896xbf16, #tpu.memory_space<vmem>>, %arg11: memref<8x896xbf16, #tpu.memory_space<vmem>>) attributes {dimension_semantics = [#tpu.dimension_semantics<parallel>], iteration_bounds = array<i64: 1>, scalar_prefetch = 0 : i64, scratch_operands = 2 : i64, tpu.core_type = #tpu.core_type<tc>, window_params = [{transform_indices = @transform_0, window_bounds = array<i64: 64, 8>}, {transform_indices = @transform_1, window_bounds = array<i64: 128, 16>}, {pipeline_mode = #tpu.pipeline_mode<synchronous>, transform_indices = @transform_2, window_bounds = array<i64: 8, 16>}, {pipeline_mode = #tpu.pipeline_mode<synchronous>, transform_indices = @transform_3, window_bounds = array<i64: 8, 72>}, {pipeline_mode = #tpu.pipeline_mode<synchronous>, transform_indices = @transform_4, window_bounds = array<i64: 8, 1>}, {pipeline_mode = #tpu.pipeline_mode<synchronous>, transform_indices = @transform_5, window_bounds = array<i64: 8, 72>}, {pipeline_mode = #tpu.pipeline_mode<synchronous>, transform_indices = @transform_6, window_bounds = array<i64: 8, 1>}, {pipeline_mode = #tpu.pipeline_mode<synchronous>, transform_indices = @transform_7, window_bounds = array<i64: 1, 768>}, {transform_indices = @transform_8, window_bounds = array<i64: 1, 8, 768>}]} {
    %cst = arith.constant 0.000000e+00 : bf16
    %0 = vector.broadcast %cst : bf16 to vector<8x896xbf16>
    %c0 = arith.constant 0 : index
    %c0_0 = arith.constant 0 : index
    %1 = vector.load %arg10[%c0, %c0_0] : memref<8x896xbf16, #tpu.memory_space<vmem>>, vector<8x896xbf16>
    tpu.vector_store %arg10[%c0, %c0_0], %0 {strides = array<i32>} : memref<8x896xbf16, #tpu.memory_space<vmem>>, vector<8x896xbf16>,
    %cst_1 = arith.constant 0.000000e+00 : bf16
    %2 = vector.broadcast %cst_1 : bf16 to vector<8x128xbf16>
    %c0_2 = arith.constant 0 : index
    %c768 = arith.constant 768 : index
    %3 = vector.load %arg11[%c0_2, %c768] : memref<8x896xbf16, #tpu.memory_space<vmem>>, vector<8x128xbf16>
    tpu.vector_store %arg11[%c0_2, %c768], %2 {strides = array<i32>} : memref<8x896xbf16, #tpu.memory_space<vmem>>, vector<8x128xbf16>,
    %c0_3 = arith.constant 0 : index
    %c0_4 = arith.constant 0 : index
    %4 = vector.load %arg1[%c0_3, %c0_4] : memref<64x8xf32, #tpu.memory_space<vmem>>, vector<64x8xf32>
    %c0_5 = arith.constant 0 : index
    %c0_6 = arith.constant 0 : index
    %5 = vector.load %arg3[%c0_5, %c0_6] : memref<8x16xf32, #tpu.memory_space<vmem>>, vector<8x16xf32>
    %cst_7 = arith.constant dense<0.000000e+00> : vector<64x16xf32>
    %6 = tpu.matmul %4, %5, %cst_7 {dimension_numbers = #tpu.dot_dimension_numbers<[1], [0], [0], [1], [0, 0, 1, 1], [], []>} : vector<64x8xf32>, vector<8x16xf32>, vector<64x16xf32> -> vector<64x16xf32>
    %c0_8 = arith.constant 0 : index
    %c0_9 = arith.constant 0 : index
    %7 = vector.load %arg2[%c0_8, %c0_9] : memref<128x16xf32, #tpu.memory_space<vmem>>, vector<4x16xf32>
    %8 = vector.extract_strided_slice %6 {offsets = [0, 0], sizes = [4, 16], strides = [1, 1]} : vector<64x16xf32> to vector<4x16xf32>
    %9 = tpu.concatenate %7, %8 in 0 : vector<4x16xf32>, vector<4x16xf32> -> vector<8x16xf32>
    %10 = arith.truncf %9 : vector<8x16xf32> to vector<8x16xbf16>
    %c0_10 = arith.constant 0 : index
    %c57 = arith.constant 57 : index
    %11 = vector.load %arg10[%c0_10, %c57] : memref<8x896xbf16, #tpu.memory_space<vmem>>, vector<8x16xbf16>
    tpu.vector_store %arg10[%c0_10, %c57], %10 {strides = array<i32>} : memref<8x896xbf16, #tpu.memory_space<vmem>>, vector<8x16xbf16>,
    %c4 = arith.constant 4 : index
    %c0_11 = arith.constant 0 : index
    %12 = vector.load %arg2[%c4, %c0_11] : memref<128x16xf32, #tpu.memory_space<vmem>>, vector<4x16xf32>
    %13 = vector.extract_strided_slice %6 {offsets = [0, 0], sizes = [4, 16], strides = [1, 1]} : vector<64x16xf32> to vector<4x16xf32>
    %cst_12 = arith.constant 0.533333361 : f32
    %14 = vector.broadcast %cst_12 : f32 to vector<4x16xf32>
    %15 = arith.mulf %14, %13 : vector<4x16xf32>
    %16 = vector.extract_strided_slice %6 {offsets = [4, 0], sizes = [4, 16], strides = [1, 1]} : vector<64x16xf32> to vector<4x16xf32>
    %cst_13 = arith.constant 0.466666669 : f32
    %17 = vector.broadcast %cst_13 : f32 to vector<4x16xf32>
    %18 = arith.mulf %17, %16 : vector<4x16xf32>
    %19 = arith.addf %15, %18 : vector<4x16xf32>
    %20 = tpu.concatenate %12, %19 in 0 : vector<4x16xf32>, vector<4x16xf32> -> vector<8x16xf32>
    %21 = arith.truncf %20 : vector<8x16xf32> to vector<8x16xbf16>
    %c0_14 = arith.constant 0 : index
    %c75 = arith.constant 75 : index
    %22 = vector.load %arg10[%c0_14, %c75] : memref<8x896xbf16, #tpu.memory_space<vmem>>, vector<8x16xbf16>
    tpu.vector_store %arg10[%c0_14, %c75], %21 {strides = array<i32>} : memref<8x896xbf16, #tpu.memory_space<vmem>>, vector<8x16xbf16>,
    %c8 = arith.constant 8 : index
    %c0_15 = arith.constant 0 : index
    %23 = vector.load %arg2[%c8, %c0_15] : memref<128x16xf32, #tpu.memory_space<vmem>>, vector<4x16xf32>
    %24 = vector.extract_strided_slice %6 {offsets = [0, 0], sizes = [4, 16], strides = [1, 1]} : vector<64x16xf32> to vector<4x16xf32>
    %cst_16 = arith.constant 0.0666666701 : f32
    %25 = vector.broadcast %cst_16 : f32 to vector<4x16xf32>
    %26 = arith.mulf %25, %24 : vector<4x16xf32>
    %27 = vector.extract_strided_slice %6 {offsets = [4, 0], sizes = [4, 16], strides = [1, 1]} : vector<64x16xf32> to vector<4x16xf32>
    %cst_17 = arith.constant 0.933333337 : f32
    %28 = vector.broadcast %cst_17 : f32 to vector<4x16xf32>
    %29 = arith.mulf %28, %27 : vector<4x16xf32>
    %30 = arith.addf %26, %29 : vector<4x16xf32>
    %31 = tpu.concatenate %23, %30 in 0 : vector<4x16xf32>, vector<4x16xf32> -> vector<8x16xf32>
    %32 = arith.truncf %31 : vector<8x16xf32> to vector<8x16xbf16>
    %c0_18 = arith.constant 0 : index
    %c93 = arith.constant 93 : index
    %33 = vector.load %arg10[%c0_18, %c93] : memref<8x896xbf16, #tpu.memory_space<vmem>>, vector<8x16xbf16>
    tpu.vector_store %arg10[%c0_18, %c93], %32 {strides = array<i32>} : memref<8x896xbf16, #tpu.memory_space<vmem>>, vector<8x16xbf16>,
    %c12 = arith.constant 12 : index
    %c0_19 = arith.constant 0 : index
    %34 = vector.load %arg2[%c12, %c0_19] : memref<128x16xf32, #tpu.memory_space<vmem>>, vector<4x16xf32>
    %35 = vector.extract_strided_slice %6 {offsets = [4, 0], sizes = [4, 16], strides = [1, 1]} : vector<64x16xf32> to vector<4x16xf32>
    %cst_20 = arith.constant 6.000000e-01 : f32
    %36 = vector.broadcast %cst_20 : f32 to vector<4x16xf32>
    %37 = arith.mulf %36, %35 : vector<4x16xf32>
    %38 = vector.extract_strided_slice %6 {offsets = [8, 0], sizes = [4, 16], strides = [1, 1]} : vector<64x16xf32> to vector<4x16xf32>
    %cst_21 = arith.constant 4.000000e-01 : f32
    %39 = vector.broadcast %cst_21 : f32 to vector<4x16xf32>
    %40 = arith.mulf %39, %38 : vector<4x16xf32>
    %41 = arith.addf %37, %40 : vector<4x16xf32>
    %42 = tpu.concatenate %34, %41 in 0 : vector<4x16xf32>, vector<4x16xf32> -> vector<8x16xf32>
    %43 = arith.truncf %42 : vector<8x16xf32> to vector<8x16xbf16>
    %c0_22 = arith.constant 0 : index
    %c111 = arith.constant 111 : index
    %44 = vector.load %arg10[%c0_22, %c111] : memref<8x896xbf16, #tpu.memory_space<vmem>>, vector<8x16xbf16>
    tpu.vector_store %arg10[%c0_22, %c111], %43 {strides = array<i32>} : memref<8x896xbf16, #tpu.memory_space<vmem>>, vector<8x16xbf16>,
    %c16 = arith.constant 16 : index
    %c0_23 = arith.constant 0 : index
    %45 = vector.load %arg2[%c16, %c0_23] : memref<128x16xf32, #tpu.memory_space<vmem>>, vector<4x16xf32>
    %46 = vector.extract_strided_slice %6 {offsets = [4, 0], sizes = [4, 16], strides = [1, 1]} : vector<64x16xf32> to vector<4x16xf32>
    %cst_24 = arith.constant 0.13333334 : f32
    %47 = vector.broadcast %cst_24 : f32 to vector<4x16xf32>
    %48 = arith.mulf %47, %46 : vector<4x16xf32>
    %49 = vector.extract_strided_slice %6 {offsets = [8, 0], sizes = [4, 16], strides = [1, 1]} : vector<64x16xf32> to vector<4x16xf32>
    %cst_25 = arith.constant 0.866666674 : f32
    %50 = vector.broadcast %cst_25 : f32 to vector<4x16xf32>
    %51 = arith.mulf %50, %49 : vector<4x16xf32>
    %52 = arith.addf %48, %51 : vector<4x16xf32>
    %53 = tpu.concatenate %45, %52 in 0 : vector<4x16xf32>, vector<4x16xf32> -> vector<8x16xf32>
    %54 = arith.truncf %53 : vector<8x16xf32> to vector<8x16xbf16>
    %c0_26 = arith.constant 0 : index
    %c129 = arith.constant 129 : index
    %55 = vector.load %arg10[%c0_26, %c129] : memref<8x896xbf16, #tpu.memory_space<vmem>>, vector<8x16xbf16>
    tpu.vector_store %arg10[%c0_26, %c129], %54 {strides = array<i32>} : memref<8x896xbf16, #tpu.memory_space<vmem>>, vector<8x16xbf16>,
    %c20 = arith.constant 20 : index
    %c0_27 = arith.constant 0 : index
    %56 = vector.load %arg2[%c20, %c0_27] : memref<128x16xf32, #tpu.memory_space<vmem>>, vector<4x16xf32>
    %57 = vector.extract_strided_slice %6 {offsets = [8, 0], sizes = [4, 16], strides = [1, 1]} : vector<64x16xf32> to vector<4x16xf32>
    %cst_28 = arith.constant 0.666666686 : f32
    %58 = vector.broadcast %cst_28 : f32 to vector<4x16xf32>
    %59 = arith.mulf %58, %57 : vector<4x16xf32>
    %60 = vector.extract_strided_slice %6 {offsets = [12, 0], sizes = [4, 16], strides = [1, 1]} : vector<64x16xf32> to vector<4x16xf32>
    %cst_29 = arith.constant 0.333333343 : f32
    %61 = vector.broadcast %cst_29 : f32 to vector<4x16xf32>
    %62 = arith.mulf %61, %60 : vector<4x16xf32>
    %63 = arith.addf %59, %62 : vector<4x16xf32>
    %64 = tpu.concatenate %56, %63 in 0 : vector<4x16xf32>, vector<4x16xf32> -> vector<8x16xf32>
    %65 = arith.truncf %64 : vector<8x16xf32> to vector<8x16xbf16>
    %c0_30 = arith.constant 0 : index
    %c147 = arith.constant 147 : index
    %66 = vector.load %arg10[%c0_30, %c147] : memref<8x896xbf16, #tpu.memory_space<vmem>>, vector<8x16xbf16>
    tpu.vector_store %arg10[%c0_30, %c147], %65 {strides = array<i32>} : memref<8x896xbf16, #tpu.memory_space<vmem>>, vector<8x16xbf16>,
    %c24 = arith.constant 24 : index
    %c0_31 = arith.constant 0 : index
    %67 = vector.load %arg2[%c24, %c0_31] : memref<128x16xf32, #tpu.memory_space<vmem>>, vector<4x16xf32>
    %68 = vector.extract_strided_slice %6 {offsets = [8, 0], sizes = [4, 16], strides = [1, 1]} : vector<64x16xf32> to vector<4x16xf32>
    %cst_32 = arith.constant 2.000000e-01 : f32
    %69 = vector.broadcast %cst_32 : f32 to vector<4x16xf32>
    %70 = arith.mulf %69, %68 : vector<4x16xf32>
    %71 = vector.extract_strided_slice %6 {offsets = [12, 0], sizes = [4, 16], strides = [1, 1]} : vector<64x16xf32> to vector<4x16xf32>
    %cst_33 = arith.constant 8.000000e-01 : f32
    %72 = vector.broadcast %cst_33 : f32 to vector<4x16xf32>
    %73 = arith.mulf %72, %71 : vector<4x16xf32>
    %74 = arith.addf %70, %73 : vector<4x16xf32>
    %75 = tpu.concatenate %67, %74 in 0 : vector<4x16xf32>, vector<4x16xf32> -> vector<8x16xf32>
    %76 = arith.truncf %75 : vector<8x16xf32> to vector<8x16xbf16>
    %c0_34 = arith.constant 0 : index
    %c165 = arith.constant 165 : index
    %77 = vector.load %arg10[%c0_34, %c165] : memref<8x896xbf16, #tpu.memory_space<vmem>>, vector<8x16xbf16>
    tpu.vector_store %arg10[%c0_34, %c165], %76 {strides = array<i32>} : memref<8x896xbf16, #tpu.memory_space<vmem>>, vector<8x16xbf16>,
    %c28 = arith.constant 28 : index
    %c0_35 = arith.constant 0 : index
    %78 = vector.load %arg2[%c28, %c0_35] : memref<128x16xf32, #tpu.memory_space<vmem>>, vector<4x16xf32>
    %79 = vector.extract_strided_slice %6 {offsets = [12, 0], sizes = [4, 16], strides = [1, 1]} : vector<64x16xf32> to vector<4x16xf32>
    %cst_36 = arith.constant 0.733333349 : f32
    %80 = vector.broadcast %cst_36 : f32 to vector<4x16xf32>
    %81 = arith.mulf %80, %79 : vector<4x16xf32>
    %82 = vector.extract_strided_slice %6 {offsets = [16, 0], sizes = [4, 16], strides = [1, 1]} : vector<64x16xf32> to vector<4x16xf32>
    %cst_37 = arith.constant 0.266666681 : f32
    %83 = vector.broadcast %cst_37 : f32 to vector<4x16xf32>
    %84 = arith.mulf %83, %82 : vector<4x16xf32>
    %85 = arith.addf %81, %84 : vector<4x16xf32>
    %86 = tpu.concatenate %78, %85 in 0 : vector<4x16xf32>, vector<4x16xf32> -> vector<8x16xf32>
    %87 = arith.truncf %86 : vector<8x16xf32> to vector<8x16xbf16>
    %c0_38 = arith.constant 0 : index
    %c183 = arith.constant 183 : index
    %88 = vector.load %arg10[%c0_38, %c183] : memref<8x896xbf16, #tpu.memory_space<vmem>>, vector<8x16xbf16>
    tpu.vector_store %arg10[%c0_38, %c183], %87 {strides = array<i32>} : memref<8x896xbf16, #tpu.memory_space<vmem>>, vector<8x16xbf16>,
    %c32 = arith.constant 32 : index
    %c0_39 = arith.constant 0 : index
    %89 = vector.load %arg2[%c32, %c0_39] : memref<128x16xf32, #tpu.memory_space<vmem>>, vector<4x16xf32>
    %90 = vector.extract_strided_slice %6 {offsets = [12, 0], sizes = [4, 16], strides = [1, 1]} : vector<64x16xf32> to vector<4x16xf32>
    %cst_40 = arith.constant 0.266666681 : f32
    %91 = vector.broadcast %cst_40 : f32 to vector<4x16xf32>
    %92 = arith.mulf %91, %90 : vector<4x16xf32>
    %93 = vector.extract_strided_slice %6 {offsets = [16, 0], sizes = [4, 16], strides = [1, 1]} : vector<64x16xf32> to vector<4x16xf32>
    %cst_41 = arith.constant 0.733333349 : f32
    %94 = vector.broadcast %cst_41 : f32 to vector<4x16xf32>
    %95 = arith.mulf %94, %93 : vector<4x16xf32>
    %96 = arith.addf %92, %95 : vector<4x16xf32>
    %97 = tpu.concatenate %89, %96 in 0 : vector<4x16xf32>, vector<4x16xf32> -> vector<8x16xf32>
    %98 = arith.truncf %97 : vector<8x16xf32> to vector<8x16xbf16>
    %c0_42 = arith.constant 0 : index
    %c201 = arith.constant 201 : index
    %99 = vector.load %arg10[%c0_42, %c201] : memref<8x896xbf16, #tpu.memory_space<vmem>>, vector<8x16xbf16>
    tpu.vector_store %arg10[%c0_42, %c201], %98 {strides = array<i32>} : memref<8x896xbf16, #tpu.memory_space<vmem>>, vector<8x16xbf16>,
    %c36 = arith.constant 36 : index
    %c0_43 = arith.constant 0 : index
    %100 = vector.load %arg2[%c36, %c0_43] : memref<128x16xf32, #tpu.memory_space<vmem>>, vector<4x16xf32>
    %101 = vector.extract_strided_slice %6 {offsets = [16, 0], sizes = [4, 16], strides = [1, 1]} : vector<64x16xf32> to vector<4x16xf32>
    %cst_44 = arith.constant 8.000000e-01 : f32
    %102 = vector.broadcast %cst_44 : f32 to vector<4x16xf32>
    %103 = arith.mulf %102, %101 : vector<4x16xf32>
    %104 = vector.extract_strided_slice %6 {offsets = [20, 0], sizes = [4, 16], strides = [1, 1]} : vector<64x16xf32> to vector<4x16xf32>
    %cst_45 = arith.constant 2.000000e-01 : f32
    %105 = vector.broadcast %cst_45 : f32 to vector<4x16xf32>
    %106 = arith.mulf %105, %104 : vector<4x16xf32>
    %107 = arith.addf %103, %106 : vector<4x16xf32>
    %108 = tpu.concatenate %100, %107 in 0 : vector<4x16xf32>, vector<4x16xf32> -> vector<8x16xf32>
    %109 = arith.truncf %108 : vector<8x16xf32> to vector<8x16xbf16>
    %c0_46 = arith.constant 0 : index
    %c219 = arith.constant 219 : index
    %110 = vector.load %arg10[%c0_46, %c219] : memref<8x896xbf16, #tpu.memory_space<vmem>>, vector<8x16xbf16>
    tpu.vector_store %arg10[%c0_46, %c219], %109 {strides = array<i32>} : memref<8x896xbf16, #tpu.memory_space<vmem>>, vector<8x16xbf16>,
    %c40 = arith.constant 40 : index
    %c0_47 = arith.constant 0 : index
    %111 = vector.load %arg2[%c40, %c0_47] : memref<128x16xf32, #tpu.memory_space<vmem>>, vector<4x16xf32>
    %112 = vector.extract_strided_slice %6 {offsets = [16, 0], sizes = [4, 16], strides = [1, 1]} : vector<64x16xf32> to vector<4x16xf32>
    %cst_48 = arith.constant 0.333333343 : f32
    %113 = vector.broadcast %cst_48 : f32 to vector<4x16xf32>
    %114 = arith.mulf %113, %112 : vector<4x16xf32>
    %115 = vector.extract_strided_slice %6 {offsets = [20, 0], sizes = [4, 16], strides = [1, 1]} : vector<64x16xf32> to vector<4x16xf32>
    %cst_49 = arith.constant 0.666666686 : f32
    %116 = vector.broadcast %cst_49 : f32 to vector<4x16xf32>
    %117 = arith.mulf %116, %115 : vector<4x16xf32>
    %118 = arith.addf %114, %117 : vector<4x16xf32>
    %119 = tpu.concatenate %111, %118 in 0 : vector<4x16xf32>, vector<4x16xf32> -> vector<8x16xf32>
    %120 = arith.truncf %119 : vector<8x16xf32> to vector<8x16xbf16>
    %c0_50 = arith.constant 0 : index
    %c237 = arith.constant 237 : index
    %121 = vector.load %arg10[%c0_50, %c237] : memref<8x896xbf16, #tpu.memory_space<vmem>>, vector<8x16xbf16>
    tpu.vector_store %arg10[%c0_50, %c237], %120 {strides = array<i32>} : memref<8x896xbf16, #tpu.memory_space<vmem>>, vector<8x16xbf16>,
    %c44 = arith.constant 44 : index
    %c0_51 = arith.constant 0 : index
    %122 = vector.load %arg2[%c44, %c0_51] : memref<128x16xf32, #tpu.memory_space<vmem>>, vector<4x16xf32>
    %123 = vector.extract_strided_slice %6 {offsets = [20, 0], sizes = [4, 16], strides = [1, 1]} : vector<64x16xf32> to vector<4x16xf32>
    %cst_52 = arith.constant 0.866666674 : f32
    %124 = vector.broadcast %cst_52 : f32 to vector<4x16xf32>
    %125 = arith.mulf %124, %123 : vector<4x16xf32>
    %126 = vector.extract_strided_slice %6 {offsets = [24, 0], sizes = [4, 16], strides = [1, 1]} : vector<64x16xf32> to vector<4x16xf32>
    %cst_53 = arith.constant 0.13333334 : f32
    %127 = vector.broadcast %cst_53 : f32 to vector<4x16xf32>
    %128 = arith.mulf %127, %126 : vector<4x16xf32>
    %129 = arith.addf %125, %128 : vector<4x16xf32>
    %130 = tpu.concatenate %122, %129 in 0 : vector<4x16xf32>, vector<4x16xf32> -> vector<8x16xf32>
    %131 = arith.truncf %130 : vector<8x16xf32> to vector<8x16xbf16>
    %c0_54 = arith.constant 0 : index
    %c255 = arith.constant 255 : index
    %132 = vector.load %arg10[%c0_54, %c255] : memref<8x896xbf16, #tpu.memory_space<vmem>>, vector<8x16xbf16>
    tpu.vector_store %arg10[%c0_54, %c255], %131 {strides = array<i32>} : memref<8x896xbf16, #tpu.memory_space<vmem>>, vector<8x16xbf16>,
    %c48 = arith.constant 48 : index
    %c0_55 = arith.constant 0 : index
    %133 = vector.load %arg2[%c48, %c0_55] : memref<128x16xf32, #tpu.memory_space<vmem>>, vector<4x16xf32>
    %134 = vector.extract_strided_slice %6 {offsets = [20, 0], sizes = [4, 16], strides = [1, 1]} : vector<64x16xf32> to vector<4x16xf32>
    %cst_56 = arith.constant 4.000000e-01 : f32
    %135 = vector.broadcast %cst_56 : f32 to vector<4x16xf32>
    %136 = arith.mulf %135, %134 : vector<4x16xf32>
    %137 = vector.extract_strided_slice %6 {offsets = [24, 0], sizes = [4, 16], strides = [1, 1]} : vector<64x16xf32> to vector<4x16xf32>
    %cst_57 = arith.constant 6.000000e-01 : f32
    %138 = vector.broadcast %cst_57 : f32 to vector<4x16xf32>
    %139 = arith.mulf %138, %137 : vector<4x16xf32>
    %140 = arith.addf %136, %139 : vector<4x16xf32>
    %141 = tpu.concatenate %133, %140 in 0 : vector<4x16xf32>, vector<4x16xf32> -> vector<8x16xf32>
    %142 = arith.truncf %141 : vector<8x16xf32> to vector<8x16xbf16>
    %c0_58 = arith.constant 0 : index
    %c273 = arith.constant 273 : index
    %143 = vector.load %arg10[%c0_58, %c273] : memref<8x896xbf16, #tpu.memory_space<vmem>>, vector<8x16xbf16>
    tpu.vector_store %arg10[%c0_58, %c273], %142 {strides = array<i32>} : memref<8x896xbf16, #tpu.memory_space<vmem>>, vector<8x16xbf16>,
    %c52 = arith.constant 52 : index
    %c0_59 = arith.constant 0 : index
    %144 = vector.load %arg2[%c52, %c0_59] : memref<128x16xf32, #tpu.memory_space<vmem>>, vector<4x16xf32>
    %145 = vector.extract_strided_slice %6 {offsets = [24, 0], sizes = [4, 16], strides = [1, 1]} : vector<64x16xf32> to vector<4x16xf32>
    %cst_60 = arith.constant 0.933333337 : f32
    %146 = vector.broadcast %cst_60 : f32 to vector<4x16xf32>
    %147 = arith.mulf %146, %145 : vector<4x16xf32>
    %148 = vector.extract_strided_slice %6 {offsets = [28, 0], sizes = [4, 16], strides = [1, 1]} : vector<64x16xf32> to vector<4x16xf32>
    %cst_61 = arith.constant 0.0666666701 : f32
    %149 = vector.broadcast %cst_61 : f32 to vector<4x16xf32>
    %150 = arith.mulf %149, %148 : vector<4x16xf32>
    %151 = arith.addf %147, %150 : vector<4x16xf32>
    %152 = tpu.concatenate %144, %151 in 0 : vector<4x16xf32>, vector<4x16xf32> -> vector<8x16xf32>
    %153 = arith.truncf %152 : vector<8x16xf32> to vector<8x16xbf16>
    %c0_62 = arith.constant 0 : index
    %c291 = arith.constant 291 : index
    %154 = vector.load %arg10[%c0_62, %c291] : memref<8x896xbf16, #tpu.memory_space<vmem>>, vector<8x16xbf16>
    tpu.vector_store %arg10[%c0_62, %c291], %153 {strides = array<i32>} : memref<8x896xbf16, #tpu.memory_space<vmem>>, vector<8x16xbf16>,
    %c56 = arith.constant 56 : index
    %c0_63 = arith.constant 0 : index
    %155 = vector.load %arg2[%c56, %c0_63] : memref<128x16xf32, #tpu.memory_space<vmem>>, vector<4x16xf32>
    %156 = vector.extract_strided_slice %6 {offsets = [24, 0], sizes = [4, 16], strides = [1, 1]} : vector<64x16xf32> to vector<4x16xf32>
    %cst_64 = arith.constant 0.466666669 : f32
    %157 = vector.broadcast %cst_64 : f32 to vector<4x16xf32>
    %158 = arith.mulf %157, %156 : vector<4x16xf32>
    %159 = vector.extract_strided_slice %6 {offsets = [28, 0], sizes = [4, 16], strides = [1, 1]} : vector<64x16xf32> to vector<4x16xf32>
    %cst_65 = arith.constant 0.533333361 : f32
    %160 = vector.broadcast %cst_65 : f32 to vector<4x16xf32>
    %161 = arith.mulf %160, %159 : vector<4x16xf32>
    %162 = arith.addf %158, %161 : vector<4x16xf32>
    %163 = tpu.concatenate %155, %162 in 0 : vector<4x16xf32>, vector<4x16xf32> -> vector<8x16xf32>
    %164 = arith.truncf %163 : vector<8x16xf32> to vector<8x16xbf16>
    %c0_66 = arith.constant 0 : index
    %c309 = arith.constant 309 : index
    %165 = vector.load %arg10[%c0_66, %c309] : memref<8x896xbf16, #tpu.memory_space<vmem>>, vector<8x16xbf16>
    tpu.vector_store %arg10[%c0_66, %c309], %164 {strides = array<i32>} : memref<8x896xbf16, #tpu.memory_space<vmem>>, vector<8x16xbf16>,
    %c60 = arith.constant 60 : index
    %c0_67 = arith.constant 0 : index
    %166 = vector.load %arg2[%c60, %c0_67] : memref<128x16xf32, #tpu.memory_space<vmem>>, vector<4x16xf32>
    %167 = vector.extract_strided_slice %6 {offsets = [28, 0], sizes = [4, 16], strides = [1, 1]} : vector<64x16xf32> to vector<4x16xf32>
    %168 = tpu.concatenate %166, %167 in 0 : vector<4x16xf32>, vector<4x16xf32> -> vector<8x16xf32>
    %169 = arith.truncf %168 : vector<8x16xf32> to vector<8x16xbf16>
    %c0_68 = arith.constant 0 : index
    %c327 = arith.constant 327 : index
    %170 = vector.load %arg10[%c0_68, %c327] : memref<8x896xbf16, #tpu.memory_space<vmem>>, vector<8x16xbf16>
    tpu.vector_store %arg10[%c0_68, %c327], %169 {strides = array<i32>} : memref<8x896xbf16, #tpu.memory_space<vmem>>, vector<8x16xbf16>,
    %c64 = arith.constant 64 : index
    %c0_69 = arith.constant 0 : index
    %171 = vector.load %arg2[%c64, %c0_69] : memref<128x16xf32, #tpu.memory_space<vmem>>, vector<4x16xf32>
    %172 = vector.extract_strided_slice %6 {offsets = [32, 0], sizes = [4, 16], strides = [1, 1]} : vector<64x16xf32> to vector<4x16xf32>
    %173 = tpu.concatenate %171, %172 in 0 : vector<4x16xf32>, vector<4x16xf32> -> vector<8x16xf32>
    %174 = arith.truncf %173 : vector<8x16xf32> to vector<8x16xbf16>
    %c0_70 = arith.constant 0 : index
    %c441 = arith.constant 441 : index
    %175 = vector.load %arg10[%c0_70, %c441] : memref<8x896xbf16, #tpu.memory_space<vmem>>, vector<8x16xbf16>
    tpu.vector_store %arg10[%c0_70, %c441], %174 {strides = array<i32>} : memref<8x896xbf16, #tpu.memory_space<vmem>>, vector<8x16xbf16>,
    %c68 = arith.constant 68 : index
    %c0_71 = arith.constant 0 : index
    %176 = vector.load %arg2[%c68, %c0_71] : memref<128x16xf32, #tpu.memory_space<vmem>>, vector<4x16xf32>
    %177 = vector.extract_strided_slice %6 {offsets = [32, 0], sizes = [4, 16], strides = [1, 1]} : vector<64x16xf32> to vector<4x16xf32>
    %cst_72 = arith.constant 0.533333361 : f32
    %178 = vector.broadcast %cst_72 : f32 to vector<4x16xf32>
    %179 = arith.mulf %178, %177 : vector<4x16xf32>
    %180 = vector.extract_strided_slice %6 {offsets = [36, 0], sizes = [4, 16], strides = [1, 1]} : vector<64x16xf32> to vector<4x16xf32>
    %cst_73 = arith.constant 0.466666669 : f32
    %181 = vector.broadcast %cst_73 : f32 to vector<4x16xf32>
    %182 = arith.mulf %181, %180 : vector<4x16xf32>
    %183 = arith.addf %179, %182 : vector<4x16xf32>
    %184 = tpu.concatenate %176, %183 in 0 : vector<4x16xf32>, vector<4x16xf32> -> vector<8x16xf32>
    %185 = arith.truncf %184 : vector<8x16xf32> to vector<8x16xbf16>
    %c0_74 = arith.constant 0 : index
    %c459 = arith.constant 459 : index
    %186 = vector.load %arg10[%c0_74, %c459] : memref<8x896xbf16, #tpu.memory_space<vmem>>, vector<8x16xbf16>
    tpu.vector_store %arg10[%c0_74, %c459], %185 {strides = array<i32>} : memref<8x896xbf16, #tpu.memory_space<vmem>>, vector<8x16xbf16>,
    %c72 = arith.constant 72 : index
    %c0_75 = arith.constant 0 : index
    %187 = vector.load %arg2[%c72, %c0_75] : memref<128x16xf32, #tpu.memory_space<vmem>>, vector<4x16xf32>
    %188 = vector.extract_strided_slice %6 {offsets = [32, 0], sizes = [4, 16], strides = [1, 1]} : vector<64x16xf32> to vector<4x16xf32>
    %cst_76 = arith.constant 0.0666666701 : f32
    %189 = vector.broadcast %cst_76 : f32 to vector<4x16xf32>
    %190 = arith.mulf %189, %188 : vector<4x16xf32>
    %191 = vector.extract_strided_slice %6 {offsets = [36, 0], sizes = [4, 16], strides = [1, 1]} : vector<64x16xf32> to vector<4x16xf32>
    %cst_77 = arith.constant 0.933333337 : f32
    %192 = vector.broadcast %cst_77 : f32 to vector<4x16xf32>
    %193 = arith.mulf %192, %191 : vector<4x16xf32>
    %194 = arith.addf %190, %193 : vector<4x16xf32>
    %195 = tpu.concatenate %187, %194 in 0 : vector<4x16xf32>, vector<4x16xf32> -> vector<8x16xf32>
    %196 = arith.truncf %195 : vector<8x16xf32> to vector<8x16xbf16>
    %c0_78 = arith.constant 0 : index
    %c477 = arith.constant 477 : index
    %197 = vector.load %arg10[%c0_78, %c477] : memref<8x896xbf16, #tpu.memory_space<vmem>>, vector<8x16xbf16>
    tpu.vector_store %arg10[%c0_78, %c477], %196 {strides = array<i32>} : memref<8x896xbf16, #tpu.memory_space<vmem>>, vector<8x16xbf16>,
    %c76 = arith.constant 76 : index
    %c0_79 = arith.constant 0 : index
    %198 = vector.load %arg2[%c76, %c0_79] : memref<128x16xf32, #tpu.memory_space<vmem>>, vector<4x16xf32>
    %199 = vector.extract_strided_slice %6 {offsets = [36, 0], sizes = [4, 16], strides = [1, 1]} : vector<64x16xf32> to vector<4x16xf32>
    %cst_80 = arith.constant 6.000000e-01 : f32
    %200 = vector.broadcast %cst_80 : f32 to vector<4x16xf32>
    %201 = arith.mulf %200, %199 : vector<4x16xf32>
    %202 = vector.extract_strided_slice %6 {offsets = [40, 0], sizes = [4, 16], strides = [1, 1]} : vector<64x16xf32> to vector<4x16xf32>
    %cst_81 = arith.constant 4.000000e-01 : f32
    %203 = vector.broadcast %cst_81 : f32 to vector<4x16xf32>
    %204 = arith.mulf %203, %202 : vector<4x16xf32>
    %205 = arith.addf %201, %204 : vector<4x16xf32>
    %206 = tpu.concatenate %198, %205 in 0 : vector<4x16xf32>, vector<4x16xf32> -> vector<8x16xf32>
    %207 = arith.truncf %206 : vector<8x16xf32> to vector<8x16xbf16>
    %c0_82 = arith.constant 0 : index
    %c495 = arith.constant 495 : index
    %208 = vector.load %arg10[%c0_82, %c495] : memref<8x896xbf16, #tpu.memory_space<vmem>>, vector<8x16xbf16>
    tpu.vector_store %arg10[%c0_82, %c495], %207 {strides = array<i32>} : memref<8x896xbf16, #tpu.memory_space<vmem>>, vector<8x16xbf16>,
    %c80 = arith.constant 80 : index
    %c0_83 = arith.constant 0 : index
    %209 = vector.load %arg2[%c80, %c0_83] : memref<128x16xf32, #tpu.memory_space<vmem>>, vector<4x16xf32>
    %210 = vector.extract_strided_slice %6 {offsets = [36, 0], sizes = [4, 16], strides = [1, 1]} : vector<64x16xf32> to vector<4x16xf32>
    %cst_84 = arith.constant 0.13333334 : f32
    %211 = vector.broadcast %cst_84 : f32 to vector<4x16xf32>
    %212 = arith.mulf %211, %210 : vector<4x16xf32>
    %213 = vector.extract_strided_slice %6 {offsets = [40, 0], sizes = [4, 16], strides = [1, 1]} : vector<64x16xf32> to vector<4x16xf32>
    %cst_85 = arith.constant 0.866666674 : f32
    %214 = vector.broadcast %cst_85 : f32 to vector<4x16xf32>
    %215 = arith.mulf %214, %213 : vector<4x16xf32>
    %216 = arith.addf %212, %215 : vector<4x16xf32>
    %217 = tpu.concatenate %209, %216 in 0 : vector<4x16xf32>, vector<4x16xf32> -> vector<8x16xf32>
    %218 = arith.truncf %217 : vector<8x16xf32> to vector<8x16xbf16>
    %c0_86 = arith.constant 0 : index
    %c513 = arith.constant 513 : index
    %219 = vector.load %arg10[%c0_86, %c513] : memref<8x896xbf16, #tpu.memory_space<vmem>>, vector<8x16xbf16>
    tpu.vector_store %arg10[%c0_86, %c513], %218 {strides = array<i32>} : memref<8x896xbf16, #tpu.memory_space<vmem>>, vector<8x16xbf16>,
    %c84 = arith.constant 84 : index
    %c0_87 = arith.constant 0 : index
    %220 = vector.load %arg2[%c84, %c0_87] : memref<128x16xf32, #tpu.memory_space<vmem>>, vector<4x16xf32>
    %221 = vector.extract_strided_slice %6 {offsets = [40, 0], sizes = [4, 16], strides = [1, 1]} : vector<64x16xf32> to vector<4x16xf32>
    %cst_88 = arith.constant 0.666666686 : f32
    %222 = vector.broadcast %cst_88 : f32 to vector<4x16xf32>
    %223 = arith.mulf %222, %221 : vector<4x16xf32>
    %224 = vector.extract_strided_slice %6 {offsets = [44, 0], sizes = [4, 16], strides = [1, 1]} : vector<64x16xf32> to vector<4x16xf32>
    %cst_89 = arith.constant 0.333333343 : f32
    %225 = vector.broadcast %cst_89 : f32 to vector<4x16xf32>
    %226 = arith.mulf %225, %224 : vector<4x16xf32>
    %227 = arith.addf %223, %226 : vector<4x16xf32>
    %228 = tpu.concatenate %220, %227 in 0 : vector<4x16xf32>, vector<4x16xf32> -> vector<8x16xf32>
    %229 = arith.truncf %228 : vector<8x16xf32> to vector<8x16xbf16>
    %c0_90 = arith.constant 0 : index
    %c531 = arith.constant 531 : index
    %230 = vector.load %arg10[%c0_90, %c531] : memref<8x896xbf16, #tpu.memory_space<vmem>>, vector<8x16xbf16>
    tpu.vector_store %arg10[%c0_90, %c531], %229 {strides = array<i32>} : memref<8x896xbf16, #tpu.memory_space<vmem>>, vector<8x16xbf16>,
    %c88 = arith.constant 88 : index
    %c0_91 = arith.constant 0 : index
    %231 = vector.load %arg2[%c88, %c0_91] : memref<128x16xf32, #tpu.memory_space<vmem>>, vector<4x16xf32>
    %232 = vector.extract_strided_slice %6 {offsets = [40, 0], sizes = [4, 16], strides = [1, 1]} : vector<64x16xf32> to vector<4x16xf32>
    %cst_92 = arith.constant 2.000000e-01 : f32
    %233 = vector.broadcast %cst_92 : f32 to vector<4x16xf32>
    %234 = arith.mulf %233, %232 : vector<4x16xf32>
    %235 = vector.extract_strided_slice %6 {offsets = [44, 0], sizes = [4, 16], strides = [1, 1]} : vector<64x16xf32> to vector<4x16xf32>
    %cst_93 = arith.constant 8.000000e-01 : f32
    %236 = vector.broadcast %cst_93 : f32 to vector<4x16xf32>
    %237 = arith.mulf %236, %235 : vector<4x16xf32>
    %238 = arith.addf %234, %237 : vector<4x16xf32>
    %239 = tpu.concatenate %231, %238 in 0 : vector<4x16xf32>, vector<4x16xf32> -> vector<8x16xf32>
    %240 = arith.truncf %239 : vector<8x16xf32> to vector<8x16xbf16>
    %c0_94 = arith.constant 0 : index
    %c549 = arith.constant 549 : index
    %241 = vector.load %arg10[%c0_94, %c549] : memref<8x896xbf16, #tpu.memory_space<vmem>>, vector<8x16xbf16>
    tpu.vector_store %arg10[%c0_94, %c549], %240 {strides = array<i32>} : memref<8x896xbf16, #tpu.memory_space<vmem>>, vector<8x16xbf16>,
    %c92 = arith.constant 92 : index
    %c0_95 = arith.constant 0 : index
    %242 = vector.load %arg2[%c92, %c0_95] : memref<128x16xf32, #tpu.memory_space<vmem>>, vector<4x16xf32>
    %243 = vector.extract_strided_slice %6 {offsets = [44, 0], sizes = [4, 16], strides = [1, 1]} : vector<64x16xf32> to vector<4x16xf32>
    %cst_96 = arith.constant 0.733333349 : f32
    %244 = vector.broadcast %cst_96 : f32 to vector<4x16xf32>
    %245 = arith.mulf %244, %243 : vector<4x16xf32>
    %246 = vector.extract_strided_slice %6 {offsets = [48, 0], sizes = [4, 16], strides = [1, 1]} : vector<64x16xf32> to vector<4x16xf32>
    %cst_97 = arith.constant 0.266666681 : f32
    %247 = vector.broadcast %cst_97 : f32 to vector<4x16xf32>
    %248 = arith.mulf %247, %246 : vector<4x16xf32>
    %249 = arith.addf %245, %248 : vector<4x16xf32>
    %250 = tpu.concatenate %242, %249 in 0 : vector<4x16xf32>, vector<4x16xf32> -> vector<8x16xf32>
    %251 = arith.truncf %250 : vector<8x16xf32> to vector<8x16xbf16>
    %c0_98 = arith.constant 0 : index
    %c567 = arith.constant 567 : index
    %252 = vector.load %arg10[%c0_98, %c567] : memref<8x896xbf16, #tpu.memory_space<vmem>>, vector<8x16xbf16>
    tpu.vector_store %arg10[%c0_98, %c567], %251 {strides = array<i32>} : memref<8x896xbf16, #tpu.memory_space<vmem>>, vector<8x16xbf16>,
    %c96 = arith.constant 96 : index
    %c0_99 = arith.constant 0 : index
    %253 = vector.load %arg2[%c96, %c0_99] : memref<128x16xf32, #tpu.memory_space<vmem>>, vector<4x16xf32>
    %254 = vector.extract_strided_slice %6 {offsets = [44, 0], sizes = [4, 16], strides = [1, 1]} : vector<64x16xf32> to vector<4x16xf32>
    %cst_100 = arith.constant 0.266666681 : f32
    %255 = vector.broadcast %cst_100 : f32 to vector<4x16xf32>
    %256 = arith.mulf %255, %254 : vector<4x16xf32>
    %257 = vector.extract_strided_slice %6 {offsets = [48, 0], sizes = [4, 16], strides = [1, 1]} : vector<64x16xf32> to vector<4x16xf32>
    %cst_101 = arith.constant 0.733333349 : f32
    %258 = vector.broadcast %cst_101 : f32 to vector<4x16xf32>
    %259 = arith.mulf %258, %257 : vector<4x16xf32>
    %260 = arith.addf %256, %259 : vector<4x16xf32>
    %261 = tpu.concatenate %253, %260 in 0 : vector<4x16xf32>, vector<4x16xf32> -> vector<8x16xf32>
    %262 = arith.truncf %261 : vector<8x16xf32> to vector<8x16xbf16>
    %c0_102 = arith.constant 0 : index
    %c585 = arith.constant 585 : index
    %263 = vector.load %arg10[%c0_102, %c585] : memref<8x896xbf16, #tpu.memory_space<vmem>>, vector<8x16xbf16>
    tpu.vector_store %arg10[%c0_102, %c585], %262 {strides = array<i32>} : memref<8x896xbf16, #tpu.memory_space<vmem>>, vector<8x16xbf16>,
    %c100 = arith.constant 100 : index
    %c0_103 = arith.constant 0 : index
    %264 = vector.load %arg2[%c100, %c0_103] : memref<128x16xf32, #tpu.memory_space<vmem>>, vector<4x16xf32>
    %265 = vector.extract_strided_slice %6 {offsets = [48, 0], sizes = [4, 16], strides = [1, 1]} : vector<64x16xf32> to vector<4x16xf32>
    %cst_104 = arith.constant 8.000000e-01 : f32
    %266 = vector.broadcast %cst_104 : f32 to vector<4x16xf32>
    %267 = arith.mulf %266, %265 : vector<4x16xf32>
    %268 = vector.extract_strided_slice %6 {offsets = [52, 0], sizes = [4, 16], strides = [1, 1]} : vector<64x16xf32> to vector<4x16xf32>
    %cst_105 = arith.constant 2.000000e-01 : f32
    %269 = vector.broadcast %cst_105 : f32 to vector<4x16xf32>
    %270 = arith.mulf %269, %268 : vector<4x16xf32>
    %271 = arith.addf %267, %270 : vector<4x16xf32>
    %272 = tpu.concatenate %264, %271 in 0 : vector<4x16xf32>, vector<4x16xf32> -> vector<8x16xf32>
    %273 = arith.truncf %272 : vector<8x16xf32> to vector<8x16xbf16>
    %c0_106 = arith.constant 0 : index
    %c603 = arith.constant 603 : index
    %274 = vector.load %arg10[%c0_106, %c603] : memref<8x896xbf16, #tpu.memory_space<vmem>>, vector<8x16xbf16>
    tpu.vector_store %arg10[%c0_106, %c603], %273 {strides = array<i32>} : memref<8x896xbf16, #tpu.memory_space<vmem>>, vector<8x16xbf16>,
    %c104 = arith.constant 104 : index
    %c0_107 = arith.constant 0 : index
    %275 = vector.load %arg2[%c104, %c0_107] : memref<128x16xf32, #tpu.memory_space<vmem>>, vector<4x16xf32>
    %276 = vector.extract_strided_slice %6 {offsets = [48, 0], sizes = [4, 16], strides = [1, 1]} : vector<64x16xf32> to vector<4x16xf32>
    %cst_108 = arith.constant 0.333333343 : f32
    %277 = vector.broadcast %cst_108 : f32 to vector<4x16xf32>
    %278 = arith.mulf %277, %276 : vector<4x16xf32>
    %279 = vector.extract_strided_slice %6 {offsets = [52, 0], sizes = [4, 16], strides = [1, 1]} : vector<64x16xf32> to vector<4x16xf32>
    %cst_109 = arith.constant 0.666666686 : f32
    %280 = vector.broadcast %cst_109 : f32 to vector<4x16xf32>
    %281 = arith.mulf %280, %279 : vector<4x16xf32>
    %282 = arith.addf %278, %281 : vector<4x16xf32>
    %283 = tpu.concatenate %275, %282 in 0 : vector<4x16xf32>, vector<4x16xf32> -> vector<8x16xf32>
    %284 = arith.truncf %283 : vector<8x16xf32> to vector<8x16xbf16>
    %c0_110 = arith.constant 0 : index
    %c621 = arith.constant 621 : index
    %285 = vector.load %arg10[%c0_110, %c621] : memref<8x896xbf16, #tpu.memory_space<vmem>>, vector<8x16xbf16>
    tpu.vector_store %arg10[%c0_110, %c621], %284 {strides = array<i32>} : memref<8x896xbf16, #tpu.memory_space<vmem>>, vector<8x16xbf16>,
    %c108 = arith.constant 108 : index
    %c0_111 = arith.constant 0 : index
    %286 = vector.load %arg2[%c108, %c0_111] : memref<128x16xf32, #tpu.memory_space<vmem>>, vector<4x16xf32>
    %287 = vector.extract_strided_slice %6 {offsets = [52, 0], sizes = [4, 16], strides = [1, 1]} : vector<64x16xf32> to vector<4x16xf32>
    %cst_112 = arith.constant 0.866666674 : f32
    %288 = vector.broadcast %cst_112 : f32 to vector<4x16xf32>
    %289 = arith.mulf %288, %287 : vector<4x16xf32>
    %290 = vector.extract_strided_slice %6 {offsets = [56, 0], sizes = [4, 16], strides = [1, 1]} : vector<64x16xf32> to vector<4x16xf32>
    %cst_113 = arith.constant 0.13333334 : f32
    %291 = vector.broadcast %cst_113 : f32 to vector<4x16xf32>
    %292 = arith.mulf %291, %290 : vector<4x16xf32>
    %293 = arith.addf %289, %292 : vector<4x16xf32>
    %294 = tpu.concatenate %286, %293 in 0 : vector<4x16xf32>, vector<4x16xf32> -> vector<8x16xf32>
    %295 = arith.truncf %294 : vector<8x16xf32> to vector<8x16xbf16>
    %c0_114 = arith.constant 0 : index
    %c639 = arith.constant 639 : index
    %296 = vector.load %arg10[%c0_114, %c639] : memref<8x896xbf16, #tpu.memory_space<vmem>>, vector<8x16xbf16>
    tpu.vector_store %arg10[%c0_114, %c639], %295 {strides = array<i32>} : memref<8x896xbf16, #tpu.memory_space<vmem>>, vector<8x16xbf16>,
    %c112 = arith.constant 112 : index
    %c0_115 = arith.constant 0 : index
    %297 = vector.load %arg2[%c112, %c0_115] : memref<128x16xf32, #tpu.memory_space<vmem>>, vector<4x16xf32>
    %298 = vector.extract_strided_slice %6 {offsets = [52, 0], sizes = [4, 16], strides = [1, 1]} : vector<64x16xf32> to vector<4x16xf32>
    %cst_116 = arith.constant 4.000000e-01 : f32
    %299 = vector.broadcast %cst_116 : f32 to vector<4x16xf32>
    %300 = arith.mulf %299, %298 : vector<4x16xf32>
    %301 = vector.extract_strided_slice %6 {offsets = [56, 0], sizes = [4, 16], strides = [1, 1]} : vector<64x16xf32> to vector<4x16xf32>
    %cst_117 = arith.constant 6.000000e-01 : f32
    %302 = vector.broadcast %cst_117 : f32 to vector<4x16xf32>
    %303 = arith.mulf %302, %301 : vector<4x16xf32>
    %304 = arith.addf %300, %303 : vector<4x16xf32>
    %305 = tpu.concatenate %297, %304 in 0 : vector<4x16xf32>, vector<4x16xf32> -> vector<8x16xf32>
    %306 = arith.truncf %305 : vector<8x16xf32> to vector<8x16xbf16>
    %c0_118 = arith.constant 0 : index
    %c657 = arith.constant 657 : index
    %307 = vector.load %arg10[%c0_118, %c657] : memref<8x896xbf16, #tpu.memory_space<vmem>>, vector<8x16xbf16>
    tpu.vector_store %arg10[%c0_118, %c657], %306 {strides = array<i32>} : memref<8x896xbf16, #tpu.memory_space<vmem>>, vector<8x16xbf16>,
    %c116 = arith.constant 116 : index
    %c0_119 = arith.constant 0 : index
    %308 = vector.load %arg2[%c116, %c0_119] : memref<128x16xf32, #tpu.memory_space<vmem>>, vector<4x16xf32>
    %309 = vector.extract_strided_slice %6 {offsets = [56, 0], sizes = [4, 16], strides = [1, 1]} : vector<64x16xf32> to vector<4x16xf32>
    %cst_120 = arith.constant 0.933333337 : f32
    %310 = vector.broadcast %cst_120 : f32 to vector<4x16xf32>
    %311 = arith.mulf %310, %309 : vector<4x16xf32>
    %312 = vector.extract_strided_slice %6 {offsets = [60, 0], sizes = [4, 16], strides = [1, 1]} : vector<64x16xf32> to vector<4x16xf32>
    %cst_121 = arith.constant 0.0666666701 : f32
    %313 = vector.broadcast %cst_121 : f32 to vector<4x16xf32>
    %314 = arith.mulf %313, %312 : vector<4x16xf32>
    %315 = arith.addf %311, %314 : vector<4x16xf32>
    %316 = tpu.concatenate %308, %315 in 0 : vector<4x16xf32>, vector<4x16xf32> -> vector<8x16xf32>
    %317 = arith.truncf %316 : vector<8x16xf32> to vector<8x16xbf16>
    %c0_122 = arith.constant 0 : index
    %c675 = arith.constant 675 : index
    %318 = vector.load %arg10[%c0_122, %c675] : memref<8x896xbf16, #tpu.memory_space<vmem>>, vector<8x16xbf16>
    tpu.vector_store %arg10[%c0_122, %c675], %317 {strides = array<i32>} : memref<8x896xbf16, #tpu.memory_space<vmem>>, vector<8x16xbf16>,
    %c120 = arith.constant 120 : index
    %c0_123 = arith.constant 0 : index
    %319 = vector.load %arg2[%c120, %c0_123] : memref<128x16xf32, #tpu.memory_space<vmem>>, vector<4x16xf32>
    %320 = vector.extract_strided_slice %6 {offsets = [56, 0], sizes = [4, 16], strides = [1, 1]} : vector<64x16xf32> to vector<4x16xf32>
    %cst_124 = arith.constant 0.466666669 : f32
    %321 = vector.broadcast %cst_124 : f32 to vector<4x16xf32>
    %322 = arith.mulf %321, %320 : vector<4x16xf32>
    %323 = vector.extract_strided_slice %6 {offsets = [60, 0], sizes = [4, 16], strides = [1, 1]} : vector<64x16xf32> to vector<4x16xf32>
    %cst_125 = arith.constant 0.533333361 : f32
    %324 = vector.broadcast %cst_125 : f32 to vector<4x16xf32>
    %325 = arith.mulf %324, %323 : vector<4x16xf32>
    %326 = arith.addf %322, %325 : vector<4x16xf32>
    %327 = tpu.concatenate %319, %326 in 0 : vector<4x16xf32>, vector<4x16xf32> -> vector<8x16xf32>
    %328 = arith.truncf %327 : vector<8x16xf32> to vector<8x16xbf16>
    %c0_126 = arith.constant 0 : index
    %c693 = arith.constant 693 : index
    %329 = vector.load %arg10[%c0_126, %c693] : memref<8x896xbf16, #tpu.memory_space<vmem>>, vector<8x16xbf16>
    tpu.vector_store %arg10[%c0_126, %c693], %328 {strides = array<i32>} : memref<8x896xbf16, #tpu.memory_space<vmem>>, vector<8x16xbf16>,
    %c124 = arith.constant 124 : index
    %c0_127 = arith.constant 0 : index
    %330 = vector.load %arg2[%c124, %c0_127] : memref<128x16xf32, #tpu.memory_space<vmem>>, vector<4x16xf32>
    %331 = vector.extract_strided_slice %6 {offsets = [60, 0], sizes = [4, 16], strides = [1, 1]} : vector<64x16xf32> to vector<4x16xf32>
    %332 = tpu.concatenate %330, %331 in 0 : vector<4x16xf32>, vector<4x16xf32> -> vector<8x16xf32>
    %333 = arith.truncf %332 : vector<8x16xf32> to vector<8x16xbf16>
    %c0_128 = arith.constant 0 : index
    %c711 = arith.constant 711 : index
    %334 = vector.load %arg10[%c0_128, %c711] : memref<8x896xbf16, #tpu.memory_space<vmem>>, vector<8x16xbf16>
    tpu.vector_store %arg10[%c0_128, %c711], %333 {strides = array<i32>} : memref<8x896xbf16, #tpu.memory_space<vmem>>, vector<8x16xbf16>,
    %c0_129 = arith.constant 0 : index
    %c0_130 = arith.constant 0 : index
    %335 = vector.load %arg10[%c0_129, %c0_130] : memref<8x896xbf16, #tpu.memory_space<vmem>>, vector<8x768xbf16>
    %c0_131 = arith.constant 0 : index
    %c1 = arith.constant 1 : index
    %336 = vector.load %arg10[%c0_131, %c1] : memref<8x896xbf16, #tpu.memory_space<vmem>>, vector<8x768xbf16>
    %c0_132 = arith.constant 0 : index
    %c2 = arith.constant 2 : index
    %337 = vector.load %arg10[%c0_132, %c2] : memref<8x896xbf16, #tpu.memory_space<vmem>>, vector<8x768xbf16>
    %338 = tpu.concatenate %335, %336, %337 in 0 : vector<8x768xbf16>, vector<8x768xbf16>, vector<8x768xbf16> -> vector<24x768xbf16>
    %c0_133 = arith.constant 0 : index
    %c0_134 = arith.constant 0 : index
    %339 = vector.load %arg4[%c0_133, %c0_134] : memref<8x72xbf16, #tpu.memory_space<vmem>>, vector<8x24xbf16>
    %cst_135 = arith.constant dense<0.000000e+00> : vector<8x768xf32>
    %340 = tpu.matmul %339, %338, %cst_135 {dimension_numbers = #tpu.dot_dimension_numbers<[1], [0], [0], [1], [0, 0, 1, 1], [], []>} : vector<8x24xbf16>, vector<24x768xbf16>, vector<8x768xf32> -> vector<8x768xf32>
    %c0_136 = arith.constant 0 : index
    %c18 = arith.constant 18 : index
    %341 = vector.load %arg10[%c0_136, %c18] : memref<8x896xbf16, #tpu.memory_space<vmem>>, vector<8x768xbf16>
    %c0_137 = arith.constant 0 : index
    %c19 = arith.constant 19 : index
    %342 = vector.load %arg10[%c0_137, %c19] : memref<8x896xbf16, #tpu.memory_space<vmem>>, vector<8x768xbf16>
    %c0_138 = arith.constant 0 : index
    %c20_139 = arith.constant 20 : index
    %343 = vector.load %arg10[%c0_138, %c20_139] : memref<8x896xbf16, #tpu.memory_space<vmem>>, vector<8x768xbf16>
    %344 = tpu.concatenate %341, %342, %343 in 0 : vector<8x768xbf16>, vector<8x768xbf16>, vector<8x768xbf16> -> vector<24x768xbf16>
    %c0_140 = arith.constant 0 : index
    %c24_141 = arith.constant 24 : index
    %345 = vector.load %arg4[%c0_140, %c24_141] : memref<8x72xbf16, #tpu.memory_space<vmem>>, vector<8x24xbf16>
    %cst_142 = arith.constant dense<0.000000e+00> : vector<8x768xf32>
    %346 = tpu.matmul %345, %344, %cst_142 {dimension_numbers = #tpu.dot_dimension_numbers<[1], [0], [0], [1], [0, 0, 1, 1], [], []>} : vector<8x24xbf16>, vector<24x768xbf16>, vector<8x768xf32> -> vector<8x768xf32>
    %347 = arith.addf %340, %346 : vector<8x768xf32>
    %c0_143 = arith.constant 0 : index
    %c36_144 = arith.constant 36 : index
    %348 = vector.load %arg10[%c0_143, %c36_144] : memref<8x896xbf16, #tpu.memory_space<vmem>>, vector<8x768xbf16>
    %c0_145 = arith.constant 0 : index
    %c37 = arith.constant 37 : index
    %349 = vector.load %arg10[%c0_145, %c37] : memref<8x896xbf16, #tpu.memory_space<vmem>>, vector<8x768xbf16>
    %c0_146 = arith.constant 0 : index
    %c38 = arith.constant 38 : index
    %350 = vector.load %arg10[%c0_146, %c38] : memref<8x896xbf16, #tpu.memory_space<vmem>>, vector<8x768xbf16>
    %351 = tpu.concatenate %348, %349, %350 in 0 : vector<8x768xbf16>, vector<8x768xbf16>, vector<8x768xbf16> -> vector<24x768xbf16>
    %c0_147 = arith.constant 0 : index
    %c48_148 = arith.constant 48 : index
    %352 = vector.load %arg4[%c0_147, %c48_148] : memref<8x72xbf16, #tpu.memory_space<vmem>>, vector<8x24xbf16>
    %cst_149 = arith.constant dense<0.000000e+00> : vector<8x768xf32>
    %353 = tpu.matmul %352, %351, %cst_149 {dimension_numbers = #tpu.dot_dimension_numbers<[1], [0], [0], [1], [0, 0, 1, 1], [], []>} : vector<8x24xbf16>, vector<24x768xbf16>, vector<8x768xf32> -> vector<8x768xf32>
    %354 = arith.addf %347, %353 : vector<8x768xf32>
    %c0_150 = arith.constant 0 : index
    %c0_151 = arith.constant 0 : index
    %355 = vector.load %arg5[%c0_150, %c0_151] : memref<8x1xf32, #tpu.memory_space<vmem>>, vector<8x1xf32>
    %356 = vector.broadcast %355 : vector<8x1xf32> to vector<8x768xf32>
    %357 = arith.addf %354, %356 : vector<8x768xf32>
    %cst_152 = arith.constant 0.000000e+00 : f32
    %358 = vector.broadcast %cst_152 : f32 to vector<8x768xf32>
    %359 = arith.maximumf %357, %358 : vector<8x768xf32>
    %c0_153 = arith.constant 0 : index
    %c0_154 = arith.constant 0 : index
    %360 = vector.load %arg8[%c0_153, %c0_154] : memref<1x768xf32, #tpu.memory_space<vmem>>, vector<1x768xf32>
    %361 = vector.broadcast %360 : vector<1x768xf32> to vector<8x768xf32>
    %362 = arith.mulf %359, %361 : vector<8x768xf32>
    %363 = arith.truncf %362 : vector<8x768xf32> to vector<8x768xbf16>
    %c0_155 = arith.constant 0 : index
    %c0_156 = arith.constant 0 : index
    %364 = vector.load %arg11[%c0_155, %c0_156] : memref<8x896xbf16, #tpu.memory_space<vmem>>, vector<8x768xbf16>
    tpu.vector_store %arg11[%c0_155, %c0_156], %363 {strides = array<i32>} : memref<8x896xbf16, #tpu.memory_space<vmem>>, vector<8x768xbf16>,
    %c0_157 = arith.constant 0 : index
    %c0_158 = arith.constant 0 : index
    %365 = vector.load %arg11[%c0_157, %c0_158] : memref<8x896xbf16, #tpu.memory_space<vmem>>, vector<8x768xbf16>
    %c0_159 = arith.constant 0 : index
    %c1_160 = arith.constant 1 : index
    %366 = vector.load %arg11[%c0_159, %c1_160] : memref<8x896xbf16, #tpu.memory_space<vmem>>, vector<8x768xbf16>
    %c0_161 = arith.constant 0 : index
    %c2_162 = arith.constant 2 : index
    %367 = vector.load %arg11[%c0_161, %c2_162] : memref<8x896xbf16, #tpu.memory_space<vmem>>, vector<8x768xbf16>
    %368 = tpu.concatenate %365, %366, %367 in 0 : vector<8x768xbf16>, vector<8x768xbf16>, vector<8x768xbf16> -> vector<24x768xbf16>
    %c0_163 = arith.constant 0 : index
    %c0_164 = arith.constant 0 : index
    %369 = vector.load %arg6[%c0_163, %c0_164] : memref<8x72xbf16, #tpu.memory_space<vmem>>, vector<8x24xbf16>
    %cst_165 = arith.constant dense<0.000000e+00> : vector<8x768xf32>
    %370 = tpu.matmul %369, %368, %cst_165 {dimension_numbers = #tpu.dot_dimension_numbers<[1], [0], [0], [1], [0, 0, 1, 1], [], []>} : vector<8x24xbf16>, vector<24x768xbf16>, vector<8x768xf32> -> vector<8x768xf32>
    %c0_166 = arith.constant 0 : index
    %c18_167 = arith.constant 18 : index
    %371 = vector.load %arg11[%c0_166, %c18_167] : memref<8x896xbf16, #tpu.memory_space<vmem>>, vector<8x768xbf16>
    %c0_168 = arith.constant 0 : index
    %c19_169 = arith.constant 19 : index
    %372 = vector.load %arg11[%c0_168, %c19_169] : memref<8x896xbf16, #tpu.memory_space<vmem>>, vector<8x768xbf16>
    %c0_170 = arith.constant 0 : index
    %c20_171 = arith.constant 20 : index
    %373 = vector.load %arg11[%c0_170, %c20_171] : memref<8x896xbf16, #tpu.memory_space<vmem>>, vector<8x768xbf16>
    %374 = tpu.concatenate %371, %372, %373 in 0 : vector<8x768xbf16>, vector<8x768xbf16>, vector<8x768xbf16> -> vector<24x768xbf16>
    %c0_172 = arith.constant 0 : index
    %c24_173 = arith.constant 24 : index
    %375 = vector.load %arg6[%c0_172, %c24_173] : memref<8x72xbf16, #tpu.memory_space<vmem>>, vector<8x24xbf16>
    %cst_174 = arith.constant dense<0.000000e+00> : vector<8x768xf32>
    %376 = tpu.matmul %375, %374, %cst_174 {dimension_numbers = #tpu.dot_dimension_numbers<[1], [0], [0], [1], [0, 0, 1, 1], [], []>} : vector<8x24xbf16>, vector<24x768xbf16>, vector<8x768xf32> -> vector<8x768xf32>
    %377 = arith.addf %370, %376 : vector<8x768xf32>
    %c0_175 = arith.constant 0 : index
    %c36_176 = arith.constant 36 : index
    %378 = vector.load %arg11[%c0_175, %c36_176] : memref<8x896xbf16, #tpu.memory_space<vmem>>, vector<8x768xbf16>
    %c0_177 = arith.constant 0 : index
    %c37_178 = arith.constant 37 : index
    %379 = vector.load %arg11[%c0_177, %c37_178] : memref<8x896xbf16, #tpu.memory_space<vmem>>, vector<8x768xbf16>
    %c0_179 = arith.constant 0 : index
    %c38_180 = arith.constant 38 : index
    %380 = vector.load %arg11[%c0_179, %c38_180] : memref<8x896xbf16, #tpu.memory_space<vmem>>, vector<8x768xbf16>
    %381 = tpu.concatenate %378, %379, %380 in 0 : vector<8x768xbf16>, vector<8x768xbf16>, vector<8x768xbf16> -> vector<24x768xbf16>
    %c0_181 = arith.constant 0 : index
    %c48_182 = arith.constant 48 : index
    %382 = vector.load %arg6[%c0_181, %c48_182] : memref<8x72xbf16, #tpu.memory_space<vmem>>, vector<8x24xbf16>
    %cst_183 = arith.constant dense<0.000000e+00> : vector<8x768xf32>
    %383 = tpu.matmul %382, %381, %cst_183 {dimension_numbers = #tpu.dot_dimension_numbers<[1], [0], [0], [1], [0, 0, 1, 1], [], []>} : vector<8x24xbf16>, vector<24x768xbf16>, vector<8x768xf32> -> vector<8x768xf32>
    %384 = arith.addf %377, %383 : vector<8x768xf32>
    %c0_184 = arith.constant 0 : index
    %c0_185 = arith.constant 0 : index
    %385 = vector.load %arg7[%c0_184, %c0_185] : memref<8x1xf32, #tpu.memory_space<vmem>>, vector<8x1xf32>
    %386 = vector.broadcast %385 : vector<8x1xf32> to vector<8x768xf32>
    %387 = arith.addf %384, %386 : vector<8x768xf32>
    %cst_186 = arith.constant 0.000000e+00 : f32
    %388 = vector.broadcast %cst_186 : f32 to vector<8x768xf32>
    %389 = arith.maximumf %387, %388 : vector<8x768xf32>
    %c0_187 = arith.constant 0 : index
    %c0_188 = arith.constant 0 : index
    %c0_189 = arith.constant 0 : index
    %390 = vector.load %arg9[%c0_187, %c0_188, %c0_189] : memref<1x8x768xf32, #tpu.memory_space<vmem>>, vector<1x8x768xf32>
    %391 = vector.shape_cast %390 : vector<1x8x768xf32> to vector<8x768xf32>
    %392 = vector.shape_cast %389 : vector<8x768xf32> to vector<1x8x768xf32>
    tpu.vector_store %arg9[%c0_187, %c0_188, %c0_189], %392 {strides = array<i32>} : memref<1x8x768xf32, #tpu.memory_space<vmem>>, vector<1x8x768xf32>,
    return
  }
  func.func @transform_0(%arg0: i32) -> (i32, i32) {
    %c0_i32 = arith.constant 0 : i32
    %c0_i32_0 = arith.constant 0 : i32
    return %arg0, %c0_i32 : i32, i32
  }
  func.func @transform_1(%arg0: i32) -> (i32, i32) {
    %c0_i32 = arith.constant 0 : i32
    %c0_i32_0 = arith.constant 0 : i32
    return %arg0, %c0_i32 : i32, i32
  }
  func.func @transform_2(%arg0: i32) -> (i32, i32) {
    %c0_i32 = arith.constant 0 : i32
    %c0_i32_0 = arith.constant 0 : i32
    %c0_i32_1 = arith.constant 0 : i32
    return %c0_i32, %c0_i32_0 : i32, i32
  }
  func.func @transform_3(%arg0: i32) -> (i32, i32) {
    %c0_i32 = arith.constant 0 : i32
    %c0_i32_0 = arith.constant 0 : i32
    %c0_i32_1 = arith.constant 0 : i32
    return %c0_i32, %c0_i32_0 : i32, i32
  }
  func.func @transform_4(%arg0: i32) -> (i32, i32) {
    %c0_i32 = arith.constant 0 : i32
    %c0_i32_0 = arith.constant 0 : i32
    %c0_i32_1 = arith.constant 0 : i32
    return %c0_i32, %c0_i32_0 : i32, i32
  }
  func.func @transform_5(%arg0: i32) -> (i32, i32) {
    %c0_i32 = arith.constant 0 : i32
    %c0_i32_0 = arith.constant 0 : i32
    %c0_i32_1 = arith.constant 0 : i32
    return %c0_i32, %c0_i32_0 : i32, i32
  }
  func.func @transform_6(%arg0: i32) -> (i32, i32) {
    %c0_i32 = arith.constant 0 : i32
    %c0_i32_0 = arith.constant 0 : i32
    %c0_i32_1 = arith.constant 0 : i32
    return %c0_i32, %c0_i32_0 : i32, i32
  }
  func.func @transform_7(%arg0: i32) -> (i32, i32) {
    %c0_i32 = arith.constant 0 : i32
    %c0_i32_0 = arith.constant 0 : i32
    %c0_i32_1 = arith.constant 0 : i32
    return %c0_i32, %c0_i32_0 : i32, i32
  }
  func.func @transform_8(%arg0: i32) -> (i32, i32, i32) {
    %c0_i32 = arith.constant 0 : i32
    %c0_i32_0 = arith.constant 0 : i32
    %c0_i32_1 = arith.constant 0 : i32
    return %arg0, %c0_i32, %c0_i32_0 : i32, i32, i32
  }
}

</mosaic_0001>

<bundles_post_ra>
// kernel: up_forward.1
= control target key start
LH: loop header
LB: loop body
LE: loop exit
PB: predicated region body
PF: predicated region fallthrough
CT: control target
= control target key end

     0   :  { %vm44_vm0 = vcmask 64512   ;;  %v2386_v9 = vmov 0   ;;  %vm3210_vm1 = vcmask 1043456   ;;  %s2387_s11 = smov 57   ;;  %s2388_s12 = smov 71   ;;  %vm187_vm2 = vcmask 593352   ;;  %s3201_s2 = inlined_call_operand.vmem [shape: f32[8,16], index: 2, kind: input, shape index: {}]   ;;  %s3202_s0 = inlined_call_operand.vmem [shape: f32[64,8], index: 0, kind: input, shape index: {}]   ;;  %s3203_s1 = inlined_call_operand.vmem [shape: f32[128,16], index: 1, kind: input, shape index: {}]   ;;  %s3204_s3 = inlined_call_operand.vmem [shape: bf16[8,72], index: 3, kind: input, shape index: {}]   ;;  %s3205_s4 = inlined_call_operand.vmem [shape: f32[8,1], index: 4, kind: input, shape index: {}]   ;;  %s3206_s7 = inlined_call_operand.vmem [shape: f32[1,768], index: 7, kind: input, shape index: {}]   ;;  %s3207_s5 = inlined_call_operand.vmem [shape: bf16[8,72], index: 5, kind: input, shape index: {}]   ;;  %s3208_s6 = inlined_call_operand.vmem [shape: f32[8,1], index: 6, kind: input, shape index: {}]   ;;  %s3209_s8 = inlined_call_operand.vmem [shape: f32[1,8,768], index: 8, kind: output, shape index: {}]  }
   0x1   :  { %v43_v0 = vld [vmem:[%s3201_s2] sm:$0xff]  ;;  %v36_v2 = vld [vmem:[%s3202_s0 + $0x8] sm:$0xff]  ;;  %v37_v3 = vld [vmem:[%s3202_s0 + $0x10] sm:$0xff]  ;;  %30 = vst [vmem:[#allocation2] sm:$0xff] %v2386_v9  ;;  %974 = vmatprep.mubr.bf16.mxu1 %v2386_v9  ;;  %2370 = vset.pattern.permute.xlu0 %v2386_v9  ;;  %s2389_s14 = smov 1   ;;  %s2390_s15 = smov 37  }
   0x2   :  { %v35_v1 = vld [vmem:[%s3202_s0] sm:$0xff]  ;;  %2334 = vmatprep.subr.mxu0 %v43_v0  ;;  %v38_v4 = vld [vmem:[%s3202_s0 + $0x18] sm:$0xff]  ;;  %v40_v6 = vld [vmem:[%s3202_s0 + $0x28] sm:$0xff]  ;;  %31 = vst [vmem:[#allocation2 + $0x8] sm:$0xff] %v2386_v9  ;;  %s2391_s20 = smov 111   ;;  %s2392_s21 = smov 127  }
   0x3   :  { %2336 = vmatprep.mubr.msk.f32.mxu0 %vm44_vm0, %v35_v1  ;;  %2335 = vmatpush3.msra.mxu0 %v43_v0  ;;  %v39_v5 = vld [vmem:[%s3202_s0 + $0x20] sm:$0xff]  ;;  %v41_v7 = vld [vmem:[%s3202_s0 + $0x30] sm:$0xff]  ;;  %v42_v8 = vld [vmem:[%s3202_s0 + $0x38] sm:$0xff]  ;;  %32 = vst [vmem:[#allocation2 + $0x10] sm:$0xff] %v2386_v9  ;;  %s2393_s25 = smov 19   ;;  %s2394_s26 = smov 17  }
   0x4   :  { %2337 = vmatmul.mubr.msk.f32.vlgmr.msra.gmra.mxu0 %vm44_vm0, %v36_v2  ;;  %33 = vst [vmem:[#allocation2 + $0x18] sm:$0xf] %v2386_v9  ;;  %34 = vst [vmem:[#allocation3 + $0x18] sm:$0xf] %v2386_v9  ;;  %v174_v11 = vld [vmem:[%s3203_s1] sm:$0xf] }
   0x5   :  { %2339 = vmatprep.mubr.msk.f32.mxu0 %vm44_vm0, %v37_v3  ;;  %v456_v12 = vld [vmem:[%s3203_s1 + $0x3c] sm:$0xf]  ;;  %v246_v16 = vld [vmem:[%s3203_s1 + $0x10] sm:$0xf]  ;;  %v229_v33 = vld [vmem:[%s3203_s1 + $0xc] sm:$0xf] }
   0x6   :  { %v283_v37 = vld [vmem:[%s3203_s1 + $0x18] sm:$0xf]  ;;  %v263_v43 = vld [vmem:[%s3203_s1 + $0x14] sm:$0xf]  ;;  %v377_v46 = vld [vmem:[%s3203_s1 + $0x2c] sm:$0xf] }
   0x7   :  { %v399_v63 = vld [vmem:[%s3203_s1 + $0x30] sm:$0xf]  ;;  %s2395_s2 = smov 75   ;;  %s2396_s13 = smov 55   ;;  %vm261_vm3 = vcmask 134152   ;;  %vm281_vm4 = vcmask 281752  }
   0x8   :  { %2340 = vmatmul.mubr.msk.f32.gmra.mxu0 %vm44_vm0, %v38_v4  ;;  %s2397_s18 = smov 93   ;;  %s2398_s19 = smov 35   ;;  %vm301_vm5 = vcmask 429352   ;;  %vm207_vm6 = vcmask 740952   ;;  %vm3212_vm7 = vcmask 576952   ;;  %vm227_vm8 = vcmask 888552  }
   0x9   :  { %2342 = vmatprep.mubr.msk.f32.mxu0 %vm44_vm0, %v39_v5  ;;  %s2399_s27 = smov 73   ;;  %s2400_s28 = smov 53   ;;  %vm244_vm9 = vcmask 1036152   ;;  %vm3211_vm10 = vcmask 724552   ;;  %vm395_vm11 = vcmask 1044472   ;;  %vm396_vm12 = vcmask 121860  }
   0xa   :  { %s2401_s0 = smov 109   ;;  %s2402_s29 = smov 91   ;;  %vm355_vm13 = vcmask 872152   ;;  %vm392_vm14 = vcmask 1039360   ;;  %vm375_vm15 = vcmask 1019752  }
   0xc   :  { %2343 = vmatmul.mubr.msk.f32.gmra.mxu0 %vm44_vm0, %v40_v6 }
   0xd   :  { %2345 = vmatprep.mubr.msk.f32.mxu0 %vm44_vm0, %v41_v7 }
  0x10   :  { %2346 = vmatmul.mubr.msk.f32.gmra.mxu0 %vm44_vm0, %v42_v8  ;;  %vm2724_vm0 = vmor %vm396_vm12, %vm395_vm11  ;;  %vm901_vm12 = vcmask 900096  }
  0x11   :  { %1056 = vmatprep.mubr.bf16.mxu0 %v2386_v9 }
  0xc4   :  { %v2496_v10 = vpop.f32.mrf.mxu0 }
  0xc5   :  { %v248_v13 = vmul.f32 0.8666667, %v2496_v10  ;;  %v285_v14 = vmul.f32 0.8, %v2496_v10  ;;  %v284_v17 = vmul.f32 0.2, %v2496_v10 }
  0xc6   :  { %v135_v15 = vpop.f32.mrf.mxu0  ;;  %v231_v18 = vmul.f32 0.4, %v2496_v10  ;;  %v265_v19 = vmul.f32 0.33333334, %v2496_v10  ;;  %v264_v27 = vmul.f32 0.6666667, %v2496_v10 }
  0xc7   :  { %v176_v20 = vrot.slane %v135_v15, 4  ;;  %v247_v21 = vmul.f32 0.13333334, %v135_v15  ;;  %v250_v22 = vrot.slane %v248_v13, 4  ;;  %v287_v23 = vrot.slane %v285_v14, 4 }
  0xc8   :  { %v2512_v24 = vpop.f32.mrf.mxu0  ;;  %v230_v25 = vmul.f32 0.6, %v135_v15  ;;  %v233_v26 = vrot.slane %v231_v18, 4  ;;  %v267_v28 = vrot.slane %v265_v19, 4  ;;  %v190_v48 = vmul.f32 0.53333336, %v135_v15 }
  0xc9   :  { %v179_v29 = vsel %vm3210_vm1, %v174_v11, %v176_v20  ;;  %v457_v30 = vsel %vm3210_vm1, %v456_v12, %v2512_v24  ;;  %v252_v31 = vadd.f32 %v250_v22, %v247_v21  ;;  %v289_v32 = vadd.f32 %v287_v23, %v284_v17  ;;  %v303_v13 = vld [vmem:[%s3203_s1 + $0x1c] sm:$0xf] }
  0xca   :  { %v2521_v34 = vpop.f32.mrf.mxu0  ;;  %v2290_v35 = vpack.c.bf16 %v179_v29, %v179_v29  ;;  %v2305_v36 = vpack.c.bf16 %v457_v30, %v457_v30  ;;  %v235_v38 = vadd.f32 %v233_v26, %v230_v25  ;;  %v379_v39 = vmul.f32 0.13333334, %v2512_v24 }
  0xcb   :  { %v253_v40 = vsel %vm3210_vm1, %v246_v16, %v252_v31  ;;  %v291_v41 = vrot.slane %v289_v32, 4  ;;  %v378_v42 = vmul.f32 0.8666667, %v2521_v34  ;;  %v269_v44 = vadd.f32 %v267_v28, %v264_v27  ;;  %v209_v31 = vld [vmem:[%s3203_s1 + $0x8] sm:$0xf] }
  0xcc   :  { %184 = vrot.lane.b32.xlu0 %v2290_v35, %s2387_s11  ;;  %462 = vrot.lane.b32.xlu1 %v2305_v36, %s2388_s12  ;;  %v236_v45 = vsel %vm3210_vm1, %v229_v33, %v235_v38  ;;  %v381_v47 = vrot.slane %v379_v39, 4  ;;  %v400_v51 = vmul.f32 0.4, %v2521_v34  ;;  %v401_v52 = vmul.f32 0.6, %v2512_v24  ;;  %v2565_v29 = vpop.f32.mrf.mxu0 }
  0xcd   :  { %v293_v49 = vsel %vm3210_vm1, %v283_v37, %v291_v41  ;;  %v271_v50 = vrot.slane %v269_v44, 4  ;;  %v2294_v53 = vpack.c.bf16 %v253_v40, %v253_v40  ;;  %v191_v56 = vmul.f32 0.46666667, %v135_v15 }
  0xce   :  { %v2296_v54 = vpack.c.bf16 %v293_v49, %v293_v49  ;;  %v383_v55 = vadd.f32 %v381_v47, %v378_v42  ;;  %v2293_v57 = vpack.c.bf16 %v236_v45, %v236_v45  ;;  %v403_v58 = vrot.slane %v401_v52, 4  ;;  %v155_v45 = vpop.f32.mrf.mxu0  ;;  %v320_v47 = vld [vmem:[%s3203_s1 + $0x20] sm:$0xf] }
  0xcf   :  { %v304_v59 = vmul.f32 0.73333335, %v2496_v10  ;;  %v305_v60 = vmul.f32 0.26666668, %v2521_v34  ;;  %v273_v62 = vsel %vm3210_vm1, %v263_v43, %v271_v50  ;;  %v193_v0 = vrot.slane %v191_v56, 4 }
  0xd0   :  { %258 = vrot.lane.b32.xlu0 %v2294_v53, %s2389_s14  ;;  %298 = vrot.lane.b32.xlu1 %v2296_v54, %s2390_s15  ;;  %v384_v61 = vsel %vm3210_vm1, %v377_v46, %v383_v55  ;;  %v211_v1 = vmul.f32 0.93333334, %v135_v15  ;;  %v405_v3 = vadd.f32 %v403_v58, %v400_v51  ;;  %v210_v5 = vmul.f32 0.06666667, %v135_v15  ;;  %v189_v15 = vld [vmem:[%s3203_s1 + $0x4] sm:$0xf] }
  0xd1   :  { %v2301_v2 = vpack.c.bf16 %v384_v61, %v384_v61  ;;  %v307_v4 = vrot.slane %v305_v60, 4  ;;  %v195_v6 = vadd.f32 %v193_v0, %v190_v48  ;;  %v417_v8 = vmul.f32 0.93333334, %v2512_v24 }
  0xd2   :  { %v213_v7 = vrot.slane %v211_v1, 4  ;;  %v418_v11 = vmul.f32 0.06666667, %v2512_v24  ;;  %v406_v12 = vsel %vm3210_vm1, %v399_v63, %v405_v3  ;;  %v322_v16 = vmul.f32 0.73333335, %v2521_v34 }
  0xd3   :  { %v309_v14 = vadd.f32 %v307_v4, %v304_v59  ;;  %v197_v17 = vrot.slane %v195_v6, 4  ;;  %v2295_v20 = vpack.c.bf16 %v273_v62, %v273_v62  ;;  %v2302_v21 = vpack.c.bf16 %v406_v12, %v406_v12  ;;  %v357_v59 = vld [vmem:[%s3203_s1 + $0x28] sm:$0xf] }
  0xd4   :  { %241 = vrot.lane.b32.xlu0 %v2293_v57, %s2391_s20  ;;  %389 = vrot.lane.b32.xlu1 %v2301_v2, %s2392_s21  ;;  %v215_v18 = vadd.f32 %v213_v7, %v210_v5  ;;  %v420_v19 = vrot.slane %v418_v11, 4  ;;  %v437_v22 = vmul.f32 0.46666667, %v2512_v24  ;;  %v438_v23 = vmul.f32 0.53333336, %v2512_v24 }
  0xd5   :  { %v310_v25 = vsel %vm3210_vm1, %v303_v13, %v309_v14  ;;  %v324_v28 = vrot.slane %v322_v16, 4  ;;  %v199_v30 = vsel %vm3210_vm1, %v189_v15, %v197_v17  ;;  %v359_v33 = vmul.f32 0.6666667, %v2521_v34  ;;  %v416_v24 = vld [vmem:[%s3203_s1 + $0x34] sm:$0xf]  ;;  %v2610_v13 = vpop.f32.mrf.mxu0 }
  0xd6   :  { %v217_v26 = vrot.slane %v215_v18, 4  ;;  %v422_v27 = vadd.f32 %v420_v19, %v417_v8  ;;  %v440_v32 = vrot.slane %v438_v23, 4  ;;  %v321_v36 = vmul.f32 0.26666668, %v2496_v10  ;;  %v436_v10 = vld [vmem:[%s3203_s1 + $0x38] sm:$0xf] }
  0xd7   :  { %v2297_v37 = vpack.c.bf16 %v310_v25, %v310_v25  ;;  %v358_v39 = vmul.f32 0.33333334, %v2521_v34  ;;  %v361_v40 = vrot.slane %v359_v33, 4  ;;  %v2291_v41 = vpack.c.bf16 %v199_v30, %v199_v30  ;;  %v467_v2 = vld [vmem:[%s3203_s1 + $0x40] sm:$0xf] }
  0xd8   :  { %278 = vrot.lane.b32.xlu0 %v2295_v20, %s2393_s25  ;;  %411 = vrot.lane.b32.xlu1 %v2302_v21, %s2394_s26  ;;  %v424_v35 = vrot.slane %v422_v27, 4  ;;  %v442_v38 = vadd.f32 %v440_v32, %v437_v22  ;;  %v219_v42 = vsel %vm3210_vm1, %v209_v31, %v217_v26  ;;  %v326_v43 = vadd.f32 %v324_v28, %v321_v36  ;;  %v534_v7 = vld [vmem:[%s3203_s1 + $0x50] sm:$0xf]  ;;  %v337_v23 = vld [vmem:[%s3203_s1 + $0x24] sm:$0xf] }
  0xd9   :  { %v536_v44 = vmul.f32 0.8666667, %v2565_v29  ;;  %v363_v49 = vadd.f32 %v361_v40, %v358_v39  ;;  %v535_v50 = vmul.f32 0.13333334, %v155_v45  ;;  %v339_v52 = vmul.f32 0.2, %v2521_v34 }
  0xda   :  { %v426_v46 = vsel %vm3210_vm1, %v416_v24, %v424_v35  ;;  %v444_v48 = vrot.slane %v442_v38, 4  ;;  %v2292_v53 = vpack.c.bf16 %v219_v42, %v219_v42  ;;  %v469_v54 = vrot.slane %v155_v45, 4  ;;  %v550_v25 = vld [vmem:[%s3203_s1 + $0x54] sm:$0xf]  ;;  %v2624_v24 = vpop.f32.mrf.mxu0 }
  0xdb   :  { %v538_v51 = vrot.slane %v536_v44, 4  ;;  %v551_v55 = vmul.f32 0.6666667, %v2565_v29  ;;  %v552_v56 = vmul.f32 0.33333334, %v2565_v29  ;;  %v2303_v57 = vpack.c.bf16 %v426_v46, %v426_v46 }
  0xdc   :  { %204 = vrot.lane.b32.xlu0 %v2291_v41, %s2395_s2  ;;  %315 = vrot.lane.b32.xlu1 %v2297_v37, %s2396_s13  ;;  %v327_v58 = vsel %vm3210_vm1, %v320_v47, %v326_v43  ;;  %v338_v60 = vmul.f32 0.8, %v2521_v34  ;;  %v341_v61 = vrot.slane %v339_v52, 4  ;;  %v446_v62 = vsel %vm3210_vm1, %v436_v10, %v444_v48  ;;  %v518_v37 = vld [vmem:[%s3203_s1 + $0x4c] sm:$0xf] }
  0xdd   :  { %v365_v63 = vrot.slane %v363_v49, 4  ;;  %v554_v0 = vrot.slane %v552_v56, 4  ;;  %v520_v1 = vmul.f32 0.4, %v2565_v29  ;;  %v540_v3 = vadd.f32 %v538_v51, %v535_v50 }
  0xde   :  { %v343_v4 = vadd.f32 %v341_v61, %v338_v60  ;;  %v570_v34 = vmul.f32 0.2, %v2565_v29  ;;  %v571_v5 = vmul.f32 0.8, %v2565_v29  ;;  %v2298_v6 = vpack.c.bf16 %v327_v58, %v327_v58  ;;  %v499_v58 = vld [vmem:[%s3203_s1 + $0x48] sm:$0xf] }
  0xdf   :  { %v556_v8 = vadd.f32 %v554_v0, %v551_v55  ;;  %v519_v11 = vmul.f32 0.6, %v155_v45  ;;  %v522_v12 = vrot.slane %v520_v1, 4  ;;  %v2304_v14 = vpack.c.bf16 %v446_v62, %v446_v62  ;;  %v658_v0 = vld [vmem:[%s3203_s1 + $0x6c] sm:$0xf] }
  0xe0   :  { %224 = vrot.lane.b32.xlu0 %v2292_v53, %s2397_s18  ;;  %431 = vrot.lane.b32.xlu1 %v2303_v57, %s2398_s19  ;;  %v573_v16 = vrot.slane %v571_v5, 4  ;;  %v481_v15 = vmul.f32 0.53333336, %v155_v45  ;;  %v482_v17 = vmul.f32 0.46666667, %v155_v45  ;;  %v367_v18 = vsel %vm3210_vm1, %v357_v59, %v365_v63 }
  0xe1   :  { %v471_v19 = vsel %vm3210_vm1, %v467_v2, %v469_v54  ;;  %v345_v20 = vrot.slane %v343_v4, 4  ;;  %v501_v21 = vmul.f32 0.93333334, %v155_v45  ;;  %v541_v22 = vsel %vm3210_vm1, %v534_v7, %v540_v3  ;;  %v480_v53 = vld [vmem:[%s3203_s1 + $0x44] sm:$0xf] }
  0xe2   :  { %v558_v26 = vrot.slane %v556_v8, 4  ;;  %v575_v27 = vadd.f32 %v573_v16, %v570_v34  ;;  %v484_v28 = vrot.slane %v482_v17, 4  ;;  %v524_v30 = vadd.f32 %v522_v12, %v519_v11  ;;  %v604_v12 = vld [vmem:[%s3203_s1 + $0x60] sm:$0xf] }
  0xe3   :  { %v500_v31 = vmul.f32 0.06666667, %v155_v45  ;;  %v503_v32 = vrot.slane %v501_v21, 4  ;;  %v660_v33 = vmul.f32 0.13333334, %v2610_v13  ;;  %v2300_v35 = vpack.c.bf16 %v367_v18, %v367_v18 }
  0xe4   :  { %332 = vrot.lane.b32.xlu0 %v2298_v6, %s2399_s27  ;;  %451 = vrot.lane.b32.xlu1 %v2304_v14, %s2400_s28  ;;  %v2306_v36 = vpack.c.bf16 %v471_v19, %v471_v19  ;;  %v486_v38 = vadd.f32 %v484_v28, %v481_v15  ;;  %v347_v39 = vsel %vm3210_vm1, %v337_v23, %v345_v20  ;;  %v577_v42 = vrot.slane %v575_v27, 4  ;;  %v569_v45 = vld [vmem:[%s3203_s1 + $0x58] sm:$0xf]  ;;  %v588_v14 = vld [vmem:[%s3203_s1 + $0x5c] sm:$0xf] }
  0xe5   :  { %v2310_v40 = vpack.c.bf16 %v541_v22, %v541_v22  ;;  %v560_v41 = vsel %vm3210_vm1, %v550_v25, %v558_v26  ;;  %v659_v43 = vmul.f32 0.8666667, %v2624_v24  ;;  %v525_v44 = vsel %vm3210_vm1, %v518_v37, %v524_v30  ;;  %v639_v37 = vld [vmem:[%s3203_s1 + $0x68] sm:$0xf] }
  0xe6   :  { %v505_v46 = vadd.f32 %v503_v32, %v500_v31  ;;  %v662_v47 = vrot.slane %v660_v33, 4  ;;  %v606_v10 = vmul.f32 0.73333335, %v2624_v24  ;;  %v2299_v48 = vpack.c.bf16 %v347_v39, %v347_v39  ;;  %v620_v31 = vld [vmem:[%s3203_s1 + $0x64] sm:$0xf] }
  0xe7   :  { %v488_v49 = vrot.slane %v486_v38, 4  ;;  %v590_v50 = vmul.f32 0.26666668, %v2624_v24  ;;  %v622_v51 = vmul.f32 0.2, %v2624_v24  ;;  %v2311_v52 = vpack.c.bf16 %v560_v41, %v560_v41 }
  0xe8   :  { %372 = vrot.lane.b32.xlu1 %v2300_v35, %s2401_s0  ;;  %476 = vrot.lane.b32.xlu0 %v2306_v36, %s2387_s11  ;;  %v2309_v54 = vpack.c.bf16 %v525_v44, %v525_v44  ;;  %v579_v55 = vsel %vm3210_vm1, %v569_v45, %v577_v42  ;;  %v605_v56 = vmul.f32 0.26666668, %v2565_v29  ;;  %v589_v57 = vmul.f32 0.73333335, %v2565_v29  ;;  %v676_v44 = vld [vmem:[%s3203_s1 + $0x70] sm:$0xf] }
  0xe9   :  { %v507_v59 = vrot.slane %v505_v46, 4  ;;  %v664_v60 = vadd.f32 %v662_v47, %v659_v43  ;;  %v608_v61 = vrot.slane %v606_v10, 4  ;;  %v641_v62 = vmul.f32 0.6666667, %v2624_v24  ;;  %v692_v45 = vld [vmem:[%s3203_s1 + $0x74] sm:$0xf] }
  0xea   :  { %v490_v63 = vsel %vm3210_vm1, %v480_v53, %v488_v49  ;;  %v592_v1 = vrot.slane %v590_v50, 4  ;;  %v621_v2 = vmul.f32 0.8, %v2624_v24  ;;  %v624_v3 = vrot.slane %v622_v51, 4  ;;  %v711_v50 = vld [vmem:[%s3203_s1 + $0x78] sm:$0xf] }
  0xeb   :  { %v640_v29 = vmul.f32 0.33333334, %v2624_v24  ;;  %v643_v4 = vrot.slane %v641_v62, 4  ;;  %v694_v34 = vmul.f32 0.06666667, %v2610_v13  ;;  %v2312_v5 = vpack.c.bf16 %v579_v55, %v579_v55 }
  0xec   :  { %546 = vrot.lane.b32.xlu1 %v2310_v40, %s2389_s14  ;;  %352 = vrot.lane.b32.xlu0 %v2299_v48, %s2402_s29  ;;  %v2307_v6 = vpack.c.bf16 %v490_v63, %v490_v63  ;;  %v665_v7 = vsel %vm3210_vm1, %v658_v0, %v664_v60  ;;  %v610_v8 = vadd.f32 %v608_v61, %v605_v56  ;;  %v678_v17 = vmul.f32 0.6, %v2610_v13  ;;  %v730_v51 = vld [vmem:[%s3203_s1 + $0x7c] sm:$0xf]  ;;  %s2403_s1 = smov 126  }
  0xed   :  { %v509_v11 = vsel %vm3210_vm1, %v499_v58, %v507_v59  ;;  %v594_v16 = vadd.f32 %v592_v1, %v589_v57  ;;  %v626_v15 = vadd.f32 %v624_v3, %v621_v2  ;;  %v645_v18 = vadd.f32 %v643_v4, %v640_v29 }
  0xee   :  { %v693_v19 = vmul.f32 0.93333334, %v2610_v13  ;;  %v696_v20 = vrot.slane %v694_v34, 4  ;;  %v713_v21 = vmul.f32 0.53333336, %v2610_v13  ;;  %v2317_v22 = vpack.c.bf16 %v665_v7, %v665_v7 }
  0xef   :  { %v2308_v23 = vpack.c.bf16 %v509_v11, %v509_v11  ;;  %v611_v25 = vsel %vm3210_vm1, %v604_v12, %v610_v8  ;;  %v595_v26 = vsel %vm3210_vm1, %v588_v14, %v594_v16  ;;  %v628_v27 = vrot.slane %v626_v15, 4 }
  0xf0   :  { %565 = vrot.lane.b32.xlu1 %v2311_v52, %s2393_s25  ;;  %530 = vrot.lane.b32.xlu0 %v2309_v54, %s2391_s20  ;;  %v677_v28 = vmul.f32 0.4, %v2624_v24  ;;  %v680_v30 = vrot.slane %v678_v17, 4  ;;  %v647_v32 = vrot.slane %v645_v18, 4  ;;  %v698_v33 = vadd.f32 %v696_v20, %v693_v19 }
  0xf1   :  { %v712_v35 = vmul.f32 0.46666667, %v2610_v13  ;;  %v715_v36 = vrot.slane %v713_v21, 4  ;;  %v2314_v38 = vpack.c.bf16 %v611_v25, %v611_v25  ;;  %v2313_v24 = vpack.c.bf16 %v595_v26, %v595_v26 }
  0xf2   :  { %v630_v39 = vsel %vm3210_vm1, %v620_v31, %v628_v27  ;;  %v649_v40 = vsel %vm3210_vm1, %v639_v37, %v647_v32  ;;  %v682_v41 = vadd.f32 %v680_v30, %v677_v28  ;;  %v700_v42 = vrot.slane %v698_v33, 4 }
  0xf3   :  { %v717_v43 = vadd.f32 %v715_v36, %v712_v35  ;;  %v2315_v46 = vpack.c.bf16 %v630_v39, %v630_v39  ;;  %v2316_v47 = vpack.c.bf16 %v649_v40, %v649_v40  ;;  %v731_v55 = vsel %vm3210_vm1, %v730_v51, %v2610_v13 }
  0xf4   :  { %584 = vrot.lane.b32.xlu1 %v2312_v5, %s2390_s15  ;;  %495 = vrot.lane.b32.xlu0 %v2307_v6, %s2395_s2  ;;  %v683_v10 = vsel %vm3210_vm1, %v676_v44, %v682_v41  ;;  %v702_v48 = vsel %vm3210_vm1, %v692_v45, %v700_v42  ;;  %v2321_v57 = vpack.c.bf16 %v731_v55, %v731_v55  ;;  %v2376_v42 = vld [vmem:[#allocation2 + $0x18] ss:$0 sps:$4 sm:$0xff]  }
  0xf5   :  { %v719_v49 = vrot.slane %v717_v43, 4  ;;  %v2318_v52 = vpack.c.bf16 %v683_v10, %v683_v10  ;;  %v2319_v53 = vpack.c.bf16 %v702_v48, %v702_v48  ;;  %v2777_v43 = vld [vmem:[%s3204_s3] sm:$0xf]  ;;  %s2405_s3 = smov 110  }
  0xf6   :  { %v2236_v44 = vcombine.low %v2777_v43, %v2777_v43 }
  0xf7   :  { %v721_v54 = vsel %vm3210_vm1, %v711_v50, %v719_v49  ;;  %vm414_vm1 = vcmask 265352  }
  0xf8   :  { %514 = vrot.lane.b32.xlu0 %v2308_v23, %s2397_s18  ;;  %670 = vrot.lane.b32.xlu1 %v2317_v22, %s2392_s21  ;;  %v2320_v56 = vpack.c.bf16 %v721_v54, %v721_v54 }
  0xfc   :  { %616 = vrot.lane.b32.xlu0 %v2314_v38, %s2399_s27  ;;  %600 = vrot.lane.b32.xlu1 %v2313_v24, %s2396_s13 }
 0x100   :  { %635 = vrot.lane.b32.xlu0 %v2315_v46, %s2402_s29  ;;  %654 = vrot.lane.b32.xlu1 %v2316_v47, %s2401_s0  ;;  %s2407_s0 = smov 80  }
 0x104   :  { %688 = vrot.lane.b32.xlu0 %v2318_v52, %s2394_s26  ;;  %707 = vrot.lane.b32.xlu1 %v2319_v53, %s2398_s19  ;;  %s2404_s19 = smov 104  }
 0x108   :  { %726 = vrot.lane.b32.xlu0 %v2320_v56, %s2400_s28  ;;  %736 = vrot.lane.b32.xlu1 %v2321_v57, %s2388_s12  ;;  %s2406_s28 = smov 92  }
 0x13e   :  { %v185_v58 = vpop.permute.xlu0 %184  ;;  %v463_v59 = vpop.permute.xlu1 %462 }
 0x13f   :  { %188 = vst.msk [vmem:[#allocation2] sm:$0xf] %vm187_vm2, %v185_v58 }
 0x142   :  { %v259_v60 = vpop.permute.xlu0 %258  ;;  %v299_v61 = vpop.permute.xlu1 %298 }
 0x143   :  { %262 = vst.msk [vmem:[#allocation2 + $0x4] sm:$0xf] %vm261_vm3, %v259_v60 }
 0x146   :  { %v242_v13 = vpop.permute.xlu0 %241  ;;  %v390_v62 = vpop.permute.xlu1 %389 }
 0x147   :  { %v391_v7 = vrot.slane %v390_v62, 4 }
 0x149   :  { %v393_v14 = vsel %vm392_vm14, %v391_v7, %v390_v62 }
 0x14a   :  { %v279_v63 = vpop.permute.xlu0 %278  ;;  %v412_v0 = vpop.permute.xlu1 %411 }
 0x14b   :  { %282 = vst.msk [vmem:[#allocation2 + $0x4] sm:$0xf] %vm281_vm4, %v279_v63 }
 0x14c   :  { %302 = vst.msk [vmem:[#allocation2 + $0x4] sm:$0xf] %vm301_vm5, %v299_v61 }
 0x14e   :  { %v205_v1 = vpop.permute.xlu0 %204  ;;  %v316_v2 = vpop.permute.xlu1 %315 }
 0x14f   :  { %208 = vst.msk [vmem:[#allocation2] sm:$0xf] %vm207_vm6, %v205_v1 }
 0x150   :  { %319 = vst.msk [vmem:[#allocation2 + $0x4] sm:$0xf] %vm3212_vm7, %v316_v2  ;;  %vm465_vm7 = vcmask 708152  }
 0x152   :  { %v225_v3 = vpop.permute.xlu0 %224  ;;  %v432_v29 = vpop.permute.xlu1 %431 }
 0x153   :  { %228 = vst.msk [vmem:[#allocation2] sm:$0xf] %vm227_vm8, %v225_v3 }
 0x154   :  { %245 = vst.msk [vmem:[#allocation2] sm:$0xf] %vm244_vm9, %v242_v13 }
 0x156   :  { %v333_v4 = vpop.permute.xlu0 %332  ;;  %v452_v34 = vpop.permute.xlu1 %451 }
 0x157   :  { %336 = vst.msk [vmem:[#allocation2 + $0x4] sm:$0xf] %vm3211_vm10, %v333_v4  ;;  %vm454_vm10 = vcmask 560552  }
 0x15a   :  { %v373_v5 = vpop.permute.xlu1 %372  ;;  %v477_v6 = vpop.permute.xlu0 %476 }
 0x15b   :  { %479 = vst.msk [vmem:[#allocation2 + $0xc] sm:$0xf] %vm187_vm2, %v477_v6  ;;  %vm434_vm2 = vcmask 412952  }
 0x15e   :  { %v547_v8 = vpop.permute.xlu1 %546  ;;  %v353_v12 = vpop.permute.xlu0 %352 }
 0x15f   :  { %549 = vst.msk [vmem:[#allocation2 + $0x10] sm:$0xf] %vm261_vm3, %v547_v8  ;;  %vm3215_vm3 = vcmask 576952  }
 0x160   :  { %356 = vst.msk [vmem:[#allocation2 + $0x4] sm:$0xf] %vm355_vm13, %v353_v12  ;;  %v1408_v12 = vld [vmem:[%s3205_s4] sm:$0xff] }
 0x161   :  { %376 = vst.msk [vmem:[#allocation2 + $0x4] sm:$0xf] %vm375_vm15, %v373_v5 }
 0x162   :  { %398 = vst.msk [vmem:[#allocation2 + $0x4] sm:$0xff] %vm2724_vm0, %v393_v14  ;;  %v566_v16 = vpop.permute.xlu1 %565  ;;  %v531_v15 = vpop.permute.xlu0 %530 }
 0x163   :  { %415 = vst.msk [vmem:[#allocation2 + $0x8] sm:$0xf] %vm414_vm1, %v412_v0 }
 0x164   :  { %435 = vst.msk [vmem:[#allocation2 + $0x8] sm:$0xf] %vm434_vm2, %v432_v29 }
 0x165   :  { %568 = vst.msk [vmem:[#allocation2 + $0x10] sm:$0xf] %vm281_vm4, %v566_v16  ;;  %vm3216_vm4 = vcmask 724552  }
 0x166   :  { %455 = vst.msk [vmem:[#allocation2 + $0x8] sm:$0xf] %vm454_vm10, %v452_v34  ;;  %v585_v17 = vpop.permute.xlu1 %584  ;;  %v496_v18 = vpop.permute.xlu0 %495 }
 0x167   :  { %466 = vst.msk [vmem:[#allocation2 + $0x8] sm:$0xf] %vm465_vm7, %v463_v59 }
 0x168   :  { %587 = vst.msk [vmem:[#allocation2 + $0x10] sm:$0xf] %vm301_vm5, %v585_v17  ;;  %vm814_vm5 = vcmask 1031168  }
 0x169   :  { %498 = vst.msk [vmem:[#allocation2 + $0xc] sm:$0xf] %vm207_vm6, %v496_v18  ;;  %v743_v19 = vld [vmem:[#allocation2] sm:$0xff] }
 0x16a   :  { %v2229_v20 = vcombine.low %v743_v19, %v743_v19  ;;  %v2741_v21 = vcombine.high %v743_v19, %v743_v19  ;;  %v515_v22 = vpop.permute.xlu0 %514  ;;  %v671_v23 = vpop.permute.xlu1 %670 }
 0x16b   :  { %517 = vst.msk [vmem:[#allocation2 + $0xc] sm:$0xf] %vm227_vm8, %v515_v22  ;;  %v672_v27 = vrot.slane %v671_v23, 4 }
 0x16c   :  { %800 = vrot.lane.b32.xlu0 %v2229_v20, %s2403_s1  ;;  %802 = vrot.lane.b32.xlu1 %v2741_v21, %s2403_s1  ;;  %533 = vst.msk [vmem:[#allocation2 + $0xc] sm:$0xf] %vm244_vm9, %v531_v15 }
 0x16d   :  { %v673_v32 = vsel %vm392_vm14, %v672_v27, %v671_v23 }
 0x16e   :  { %v617_v25 = vpop.permute.xlu0 %616  ;;  %v601_v26 = vpop.permute.xlu1 %600 }
 0x16f   :  { %603 = vst.msk [vmem:[#allocation2 + $0x10] sm:$0xf] %vm3215_vm3, %v601_v26  ;;  %vm920_vm3 = vcmask 195584  }
 0x170   :  { %782 = vrot.lane.b32.xlu0 %v2741_v21, %s2392_s21  ;;  %780 = vrot.lane.b32.xlu1 %v2229_v20, %s2392_s21  ;;  %619 = vst.msk [vmem:[#allocation2 + $0x10] sm:$0xf] %vm3216_vm4, %v617_v25 }
 0x172   :  { %v636_v28 = vpop.permute.xlu0 %635  ;;  %v655_v30 = vpop.permute.xlu1 %654 }
 0x173   :  { %638 = vst.msk [vmem:[#allocation2 + $0x10] sm:$0xf] %vm355_vm13, %v636_v28  ;;  %v744_v31 = vld [vmem:[#allocation2 + $0x8] sm:$0xff] }
 0x174   :  { %657 = vst.msk [vmem:[#allocation2 + $0x10] sm:$0xf] %vm375_vm15, %v655_v30  ;;  %v2756_v33 = vcombine.low %v744_v31, %v744_v31  ;;  %v2232_v35 = vcombine.high %v744_v31, %v744_v31 }
 0x175   :  { %675 = vst.msk [vmem:[#allocation2 + $0x10] sm:$0xff] %vm2724_vm0, %v673_v32 }
 0x176   :  { %804 = vrot.lane.b32.xlu0 %v2756_v33, %s2403_s1  ;;  %v689_v36 = vpop.permute.xlu0 %688  ;;  %806 = vrot.lane.b32.xlu1 %v2232_v35, %s2403_s1  ;;  %v708_v37 = vpop.permute.xlu1 %707 }
 0x177   :  { %691 = vst.msk [vmem:[#allocation2 + $0x14] sm:$0xf] %vm414_vm1, %v689_v36  ;;  %vm3217_vm1 = vcmask 1043456  }
 0x178   :  { %710 = vst.msk [vmem:[#allocation2 + $0x14] sm:$0xf] %vm434_vm2, %v708_v37  ;;  %vm3218_vm6 = vmmov %vm3217_vm1 }
 0x179   :  { %vm3220_vm8 = vmmov %vm3217_vm1 }
 0x17a   :  { %786 = vrot.lane.b32.xlu0 %v2232_v35, %s2392_s21  ;;  %v727_v38 = vpop.permute.xlu0 %726  ;;  %784 = vrot.lane.b32.xlu1 %v2756_v33, %s2392_s21  ;;  %v737_v24 = vpop.permute.xlu1 %736  ;;  %vm3221_vm9 = vmmov %vm3217_vm1 }
 0x17b   :  { %729 = vst.msk [vmem:[#allocation2 + $0x14] sm:$0xf] %vm454_vm10, %v727_v38  ;;  %vm3222_vm10 = vmmov %vm3217_vm1 }
 0x17c   :  { %739 = vst.msk [vmem:[#allocation2 + $0x14] sm:$0xf] %vm465_vm7, %v737_v24  ;;  %vm3219_vm7 = vmmov %vm3217_vm1 }
 0x17d   :  { %vm3223_vm11 = vmmov %vm3217_vm1 }
 0x17e   :  { %vm3224_vm13 = vmmov %vm3217_vm1 }
 0x17f   :  { %vm3225_vm15 = vmmov %vm3217_vm1 }
 0x180   :  { %vm3226_vm0 = vmmov %vm3217_vm1 }
 0x181   :  { %vm3227_vm2 = vmmov %vm3226_vm0 }
 0x182   :  { %vm3228_vm4 = vmmov %vm3226_vm0 }
 0x183   :  { %v745_v39 = vld [vmem:[#allocation2 + $0x10] sm:$0xff] }
 0x184   :  { %v2234_v40 = vcombine.high %v745_v39, %v745_v39  ;;  %v2233_v41 = vcombine.low %v745_v39, %v745_v39 }
 0x186   :  { %810 = vrot.lane.b32.xlu1 %v2234_v40, %s2403_s1  ;;  %808 = vrot.lane.b32.xlu0 %v2233_v41, %s2403_s1 }
 0x18a   :  { %790 = vrot.lane.b32.xlu1 %v2234_v40, %s2392_s21  ;;  %788 = vrot.lane.b32.xlu0 %v2233_v41, %s2392_s21 }
 0x18e   :  { %792 = vrot.lane.b32.xlu1 %v2376_v42, %s2392_s21  ;;  %812 = vrot.lane.b32.xlu0 %v2376_v42, %s2403_s1 }
 0x192   :  { %864 = vrot.lane.b32.xlu0 %v2236_v44, %s2404_s19 }
 0x1de   :  { %v801_v45 = vpop.permute.xlu0 %800  ;;  %v803_v46 = vpop.permute.xlu1 %802 }
 0x1df   :  { %v2815_v63 = vsel %vm814_vm5, %v801_v45, %v803_v46 }
 0x1e2   :  { %v783_v47 = vpop.permute.xlu0 %782  ;;  %v781_v10 = vpop.permute.xlu1 %780 }
 0x1e3   :  { %v794_v48 = vsel %vm392_vm14, %v781_v10, %v783_v47 }
 0x1e4   :  { %v2786_v49 = vsel %vm3217_vm1, %v2229_v20, %v794_v48  ;;  %vm3229_vm1 = vmmov %vm3226_vm0 }
 0x1e5   :  { %873 = vrot.lane.b32.xlu1 %v2786_v49, %s2405_s3 }
 0x1e8   :  { %v805_v50 = vpop.permute.xlu0 %804  ;;  %v807_v51 = vpop.permute.xlu1 %806 }
 0x1e9   :  { %v2791_v52 = vsel %vm814_vm5, %v803_v46, %v805_v50  ;;  %v2825_v2 = vsel %vm814_vm5, %v805_v50, %v807_v51 }
 0x1ea   :  { %889 = vrot.lane.b32.xlu1 %v2791_v52, %s2405_s3 }
 0x1ec   :  { %v785_v53 = vpop.permute.xlu1 %784  ;;  %v787_v56 = vpop.permute.xlu0 %786 }
 0x1ed   :  { %v795_v54 = vsel %vm392_vm14, %v783_v47, %v785_v53  ;;  %v796_v3 = vsel %vm392_vm14, %v785_v53, %v787_v56 }
 0x1ee   :  { %v2798_v55 = vsel %vm3218_vm6, %v2741_v21, %v795_v54  ;;  %v2834_v4 = vsel %vm3220_vm8, %v2756_v33, %v796_v3  ;;  %vm3230_vm6 = vmmov %vm3226_vm0 }
 0x1ef   :  { %875 = vrot.lane.b32.xlu1 %v2798_v55, %s2405_s3  ;;  %vm3232_vm8 = vmmov %vm3226_vm0 }
 0x1f8   :  { %v809_v57 = vpop.permute.xlu0 %808  ;;  %v811_v58 = vpop.permute.xlu1 %810 }
 0x1f9   :  { %v2803_v59 = vsel %vm814_vm5, %v809_v57, %v811_v58  ;;  %v2842_v5 = vsel %vm814_vm5, %v807_v51, %v809_v57 }
 0x1fa   :  { %895 = vrot.lane.b32.xlu1 %v2803_v59, %s2405_s3 }
 0x1fc   :  { %v789_v60 = vpop.permute.xlu0 %788  ;;  %v791_v0 = vpop.permute.xlu1 %790 }
 0x1fd   :  { %v797_v62 = vsel %vm392_vm14, %v787_v56, %v789_v60  ;;  %v798_v6 = vsel %vm392_vm14, %v789_v60, %v791_v0 }
 0x1fe   :  { %v2820_v1 = vsel %vm3219_vm7, %v2232_v35, %v797_v62  ;;  %v2853_v8 = vsel %vm3222_vm10, %v2233_v41, %v798_v6  ;;  %vm3231_vm7 = vmmov %vm3226_vm0  ;;  %vm1239_vm10 = vcmask 752640  }
 0x1ff   :  { %v1069_v50 = vsel %vm3231_vm7, %v2815_v63, 0  ;;  %vm3241_vm7 = vmmov %vm3226_vm0 }
 0x200   :  { %v813_v61 = vpop.permute.xlu0 %812  ;;  %v793_v29 = vpop.permute.xlu1 %792 }
 0x201   :  { %899 = vrot.lane.b32.xlu0 %v813_v61, %s2405_s3  ;;  %v2809_v13 = vsel %vm814_vm5, %v811_v58, %v813_v61  ;;  %v799_v34 = vsel %vm392_vm14, %v791_v0, %v793_v29  ;;  %v860_v11 = vsel %vm3223_vm11, %v2376_v42, %v793_v29  ;;  %vm3234_vm11 = vmmov %vm3226_vm0 }
 0x202   :  { %897 = vrot.lane.b32.xlu1 %v2809_v13, %s2405_s3  ;;  %v2848_v7 = vsel %vm3221_vm9, %v2234_v40, %v799_v34  ;;  %vm3233_vm9 = vmmov %vm3226_vm0 }
 0x204   :  { %v865_v17 = vpop.permute.xlu0 %864 }
 0x205   :  { %887 = vrot.lane.b32.xlu0 %v2815_v63, %s2405_s3 }
 0x206   :  { %879 = vrot.lane.b32.xlu1 %v2820_v1, %s2405_s3 }
 0x209   :  { %891 = vrot.lane.b32.xlu0 %v2825_v2, %s2405_s3 }
 0x20a   :  { %1225 = vrot.lane.b32.xlu1 %v2815_v63, %s2406_s28 }
 0x20d   :  { %877 = vrot.lane.b32.xlu0 %v2834_v4, %s2405_s3 }
 0x20e   :  { %1229 = vrot.lane.b32.xlu1 %v2825_v2, %s2406_s28 }
 0x211   :  { %893 = vrot.lane.b32.xlu0 %v2842_v5, %s2405_s3 }
 0x212   :  { %883 = vrot.lane.b32.xlu1 %v2848_v7, %s2405_s3 }
 0x215   :  { %881 = vrot.lane.b32.xlu0 %v2853_v8, %s2405_s3 }
 0x216   :  { %1233 = vrot.lane.b32.xlu1 %v2803_v59, %s2406_s28 }
 0x219   :  { %885 = vrot.lane.b32.xlu0 %v860_v11, %s2405_s3 }
 0x21a   :  { %1215 = vrot.lane.b32.xlu1 %v2834_v4, %s2406_s28 }
 0x21d   :  { %1227 = vrot.lane.b32.xlu0 %v2791_v52, %s2406_s28 }
 0x21e   :  { %1235 = vrot.lane.b32.xlu1 %v2809_v13, %s2406_s28 }
 0x221   :  { %1231 = vrot.lane.b32.xlu0 %v2842_v5, %s2406_s28 }
 0x222   :  { %1219 = vrot.lane.b32.xlu1 %v2853_v8, %s2406_s28 }
 0x225   :  { %1213 = vrot.lane.b32.xlu0 %v2798_v55, %s2406_s28 }
 0x226   :  { %1209 = vrot.lane.b32.xlu1 %v2236_v44, %s2407_s0 }
 0x229   :  { %1211 = vrot.lane.b32.xlu0 %v2786_v49, %s2406_s28 }
 0x22a   :  { %1223 = vrot.lane.b32.xlu1 %v860_v11, %s2406_s28 }
 0x22d   :  { %1217 = vrot.lane.b32.xlu0 %v2820_v1, %s2406_s28 }
 0x231   :  { %1237 = vrot.lane.b32.xlu0 %v813_v61, %s2406_s28 }
 0x235   :  { %1221 = vrot.lane.b32.xlu0 %v2848_v7, %s2406_s28 }
 0x239   :  { %1411 = vperm.xlu0 %2370, %v1408_v12  }
 0x257   :  { %v874_v14 = vpop.permute.xlu1 %873 }
 0x25c   :  { %v890_v16 = vpop.permute.xlu1 %889 }
 0x261   :  { %v876_v15 = vpop.permute.xlu1 %875 }
 0x262   :  { %v902_v37 = vsel %vm901_vm12, %v874_v14, %v876_v15  ;;  %v2964_v14 = vld [vmem:[#allocation3 + $0x18] ss:$0 sps:$4 sm:$0xff]  }
 0x263   :  { %1563 = vrot.lane.b32.xlu0 %v2964_v14, %s2403_s1 }
 0x26c   :  { %v896_v18 = vpop.permute.xlu1 %895 }
 0x273   :  { %v900_v19 = vpop.permute.xlu0 %899 }
 0x274   :  { %v898_v20 = vpop.permute.xlu1 %897 }
 0x275   :  { %v912_v21 = vsel %vm901_vm12, %v896_v18, %v898_v20  ;;  %v913_v22 = vsel %vm901_vm12, %v898_v20, %v900_v19 }
 0x276   :  { %v937_v23 = vsel %vm3224_vm13, %v912_v21, 0  ;;  %2241 = vmatprep.subr.msk.bf16.mxu0 %vm3225_vm15, %v913_v22  ;;  %vm3235_vm13 = vmmov %vm3226_vm0 }
 0x277   :  { %v888_v25 = vpop.permute.xlu0 %887  ;;  %1037 = vmatpush1.bf16.msra.mxu0 %v937_v23  ;;  %v1081_v56 = vsel %vm3235_vm13, %v2803_v59, 0  ;;  %vm3236_vm15 = vmmov %vm3226_vm0 }
 0x278   :  { %v880_v26 = vpop.permute.xlu1 %879  ;;  %v908_v27 = vsel %vm901_vm12, %v888_v25, %v890_v16  ;;  %vm3245_vm13 = vmmov %vm3226_vm0 }
 0x279   :  { %v925_v32 = vsel %vm3227_vm2, %v908_v27, 0  ;;  %vm3237_vm2 = vmmov %vm3226_vm0 }
 0x27b   :  { %v892_v28 = vpop.permute.xlu0 %891 }
 0x27c   :  { %v1226_v30 = vpop.permute.xlu1 %1225  ;;  %v909_v31 = vsel %vm901_vm12, %v890_v16, %v892_v28 }
 0x27d   :  { %2237 = vmatprep.subr.msk.bf16.mxu1 %vm3226_vm0, %v909_v31 }
 0x27e   :  { %955 = vmatpush1.bf16.msra.mxu1 %v925_v32 }
 0x27f   :  { %v878_v33 = vpop.permute.xlu0 %877 }
 0x280   :  { %v1230_v35 = vpop.permute.xlu1 %1229  ;;  %v903_v36 = vsel %vm901_vm12, %v876_v15, %v878_v33  ;;  %v904_v46 = vsel %vm901_vm12, %v878_v33, %v880_v26  ;;  %v1428_v33 = vlaneseq }
 0x281   :  { %956 = vmatprep.subr.bf16.mxu1 %v903_v36 }
 0x282   :  { %957 = vmatpush1.bf16.msra.mxu1 %v902_v37 }
 0x283   :  { %v894_v38 = vpop.permute.xlu0 %893 }
 0x284   :  { %v910_v24 = vsel %vm901_vm12, %v892_v28, %v894_v38  ;;  %v911_v39 = vsel %vm901_vm12, %v894_v38, %v896_v18  ;;  %v884_v40 = vpop.permute.xlu1 %883 }
 0x285   :  { %v931_v41 = vsel %vm3228_vm4, %v910_v24, 0  ;;  %2238 = vmatmul.mubr.msk.bf16.vlgmr.msra.gmra.mxu1 %vm920_vm3, %v865_v17  ;;  %2239 = vmatprep.subr.msk.bf16.mxu1 %vm3229_vm1, %v911_v39  ;;  %vm3238_vm4 = vmmov %vm3226_vm0  ;;  %v1429_v24 = vshrl.u32 %v1428_v33, 7 }
 0x286   :  { %996 = vmatpush1.bf16.msra.mxu1 %v931_v41  ;;  %1015 = vmatprep.mubr.bf16.mxu1 %v2386_v9  ;;  %vm3239_vm1 = vmmov %vm3226_vm0 }
 0x287   :  { %v882_v42 = vpop.permute.xlu0 %881 }
 0x288   :  { %v2901_v44 = vpop.permute.xlu1 %1233  ;;  %v905_v45 = vsel %vm901_vm12, %v880_v26, %v882_v42  ;;  %v906_v48 = vsel %vm901_vm12, %v882_v42, %v884_v40 }
 0x289   :  { %997 = vmatprep.subr.bf16.mxu1 %v905_v45 }
 0x28a   :  { %998 = vmatpush1.bf16.msra.mxu1 %v904_v46  ;;  %v1430_v46 = vsub.s32 0, %v1429_v24 }
 0x28b   :  { %v886_v47 = vpop.permute.xlu0 %885  ;;  %2243 = vmatprep.subr.msk.bf16.mxu1 %vm3230_vm6, %v2791_v52  ;;  %v1075_v52 = vsel %vm3233_vm9, %v2825_v2, 0  ;;  %vm3240_vm6 = vmmov %vm3226_vm0 }
 0x28c   :  { %v907_v10 = vsel %vm901_vm12, %v884_v40, %v886_v47  ;;  %v1216_v51 = vpop.permute.xlu1 %1215  ;;  %v1434_v47 = vsub.s32 1, %v1429_v24  ;;  %vm3243_vm9 = vmmov %vm3226_vm0 }
 0x28d   :  { %2240 = vmatmul.mubr.msk.bf16.vlgmr.msra.gmra.mxu1 %vm920_vm3, %v865_v17  ;;  %1038 = vmatprep.subr.bf16.mxu0 %v907_v10 }
 0x28e   :  { %1039 = vmatpush1.bf16.msra.mxu0 %v906_v48  ;;  %1099 = vmatpush1.bf16.msra.mxu1 %v1069_v50  ;;  %v1426_v50 = vld [vmem:[%s3206_s7] sm:$0x3f] }
 0x28f   :  { %v1228_v53 = vpop.permute.xlu0 %1227  ;;  %1100 = vmatprep.subr.bf16.mxu1 %v2798_v55  ;;  %2245 = vmatprep.subr.msk.bf16.mxu0 %vm3232_vm8, %v2842_v5  ;;  %vm3242_vm8 = vmmov %vm3226_vm0 }
 0x290   :  { %1118 = vmatprep.mubr.bf16.mxu1 %v2386_v9  ;;  %v1236_v55 = vpop.permute.xlu1 %1235  ;;  %v1246_v57 = vsel %vm1239_vm10, %v1226_v30, %v1228_v53 }
 0x291   :  { %2242 = vmatmul.mubr.msk.bf16.vlgmr.msra.gmra.mxu0 %vm920_vm3, %v865_v17  ;;  %v1262_v60 = vsel %vm3226_vm0, %v1246_v57, 0  ;;  %v1250_v34 = vsel %vm1239_vm10, %v2901_v44, %v1236_v55  ;;  %v1435_v57 = vrot.slane %v1426_v50, %v1434_v47 }
 0x292   :  { %1101 = vmatpush1.bf16.msra.mxu1 %v2786_v49  ;;  %1140 = vmatpush1.bf16.msra.mxu0 %v1075_v52  ;;  %v1247_v49 = vsel %vm1239_vm10, %v1228_v53, %v1230_v35  ;;  %v1274_v6 = vsel %vm3239_vm1, %v1250_v34, 0  ;;  %vm3251_vm1 = vmmov %vm3226_vm0 }
 0x293   :  { %v1232_v54 = vpop.permute.xlu0 %1231  ;;  %1141 = vmatprep.subr.bf16.mxu0 %v2820_v1  ;;  %2247 = vmatprep.subr.msk.bf16.mxu1 %vm3234_vm11, %v2809_v13  ;;  %vm3244_vm11 = vmmov %vm3226_vm0 }
 0x294   :  { %1159 = vmatprep.mubr.bf16.mxu0 %v2386_v9  ;;  %v1248_v59 = vsel %vm1239_vm10, %v1230_v35, %v1232_v54  ;;  %v1249_v61 = vsel %vm1239_vm10, %v1232_v54, %v2901_v44  ;;  %v1220_v13 = vpop.permute.xlu1 %1219 }
 0x295   :  { %2244 = vmatmul.mubr.msk.bf16.vlgmr.msra.gmra.mxu1 %vm920_vm3, %v2777_v43  ;;  %v1268_v1 = vsel %vm3238_vm4, %v1248_v59, 0  ;;  %v1442_v59 = vsub.s32 3, %v1429_v24  ;;  %vm3250_vm4 = vmmov %vm3226_vm0 }
 0x296   :  { %1142 = vmatpush1.bf16.msra.mxu0 %v2834_v4  ;;  %1181 = vmatpush1.bf16.msra.mxu1 %v1081_v56  ;;  %v1431_v56 = vrot.slane %v1426_v50, %v1430_v46 }
 0x297   :  { %v1214_v58 = vpop.permute.xlu0 %1213  ;;  %1182 = vmatprep.subr.bf16.mxu1 %v2848_v7  ;;  %2249 = vmatprep.subr.msk.bf16.mxu0 %vm3236_vm15, %v1247_v49  ;;  %v1443_v34 = vrot.slane %v1426_v50, %v1442_v59  ;;  %vm3246_vm15 = vmmov %vm3226_vm0 }
 0x298   :  { %1200 = vmatprep.mubr.bf16.mxu1 %v2386_v9  ;;  %v1241_v62 = vsel %vm1239_vm10, %v1214_v58, %v1216_v51  ;;  %v1210_v3 = vpop.permute.xlu1 %1209 }
 0x299   :  { %2246 = vmatmul.mubr.msk.bf16.vlgmr.msra.gmra.mxu0 %vm920_vm3, %v2777_v43 }
 0x29a   :  { %1183 = vmatpush1.bf16.msra.mxu1 %v2853_v8  ;;  %1292 = vmatpush1.bf16.msra.mxu0 %v1262_v60  ;;  %v1438_v60 = vsub.s32 2, %v1429_v24 }
 0x29b   :  { %v1212_v63 = vpop.permute.xlu0 %1211  ;;  %1293 = vmatprep.subr.bf16.mxu0 %v1241_v62  ;;  %2251 = vmatprep.subr.msk.bf16.mxu1 %vm3237_vm2, %v1249_v61  ;;  %vm3249_vm2 = vmmov %vm3226_vm0 }
 0x29c   :  { %v1240_v0 = vsel %vm1239_vm10, %v1212_v63, %v1214_v58  ;;  %1311 = vmatprep.mubr.bf16.mxu0 %v2386_v9  ;;  %v1224_v7 = vpop.permute.xlu1 %1223 }
 0x29d   :  { %2248 = vmatmul.mubr.msk.bf16.vlgmr.msra.gmra.mxu1 %vm920_vm3, %v2777_v43 }
 0x29e   :  { %1294 = vmatpush1.bf16.msra.mxu0 %v1240_v0  ;;  %1333 = vmatpush1.bf16.msra.mxu1 %v1268_v1 }
 0x29f   :  { %v1218_v2 = vpop.permute.xlu0 %1217  ;;  %1352 = vmatprep.mubr.bf16.mxu1 %v2386_v9 }
 0x2a0   :  { %v1242_v29 = vsel %vm1239_vm10, %v1216_v51, %v1218_v2  ;;  %v1243_v4 = vsel %vm1239_vm10, %v1218_v2, %v1220_v13 }
 0x2a1   :  { %2250 = vmatmul.mubr.msk.bf16.vlgmr.msra.gmra.mxu0 %vm920_vm3, %v1210_v3  ;;  %1334 = vmatprep.subr.bf16.mxu1 %v1243_v4  ;;  %v1439_v4 = vrot.slane %v1426_v50, %v1438_v60 }
 0x2a2   :  { %1335 = vmatpush1.bf16.msra.mxu1 %v1242_v29  ;;  %1393 = vmatprep.mubr.bf16.mxu0 %v2386_v9 }
 0x2a3   :  { %v1238_v43 = vpop.permute.xlu0 %1237 }
 0x2a4   :  { %v1251_v5 = vsel %vm1239_vm10, %v1236_v55, %v1238_v43 }
 0x2a5   :  { %2252 = vmatmul.mubr.msk.bf16.vlgmr.msra.gmra.mxu1 %vm920_vm3, %v1210_v3  ;;  %2253 = vmatprep.subr.msk.bf16.mxu0 %vm3240_vm6, %v1251_v5  ;;  %vm3252_vm6 = vmmov %vm3226_vm0 }
 0x2a6   :  { %1374 = vmatpush1.bf16.msra.mxu0 %v1274_v6  ;;  %1722 = vmatprep.mubr.bf16.mxu1 %v2386_v9 }
 0x2a7   :  { %v1222_v8 = vpop.permute.xlu0 %1221 }
 0x2a8   :  { %v1244_v11 = vsel %vm1239_vm10, %v1220_v13, %v1222_v8  ;;  %v1245_v12 = vsel %vm1239_vm10, %v1222_v8, %v1224_v7 }
 0x2a9   :  { %1375 = vmatprep.subr.bf16.mxu0 %v1245_v12 }
 0x2aa   :  { %1376 = vmatpush1.bf16.msra.mxu0 %v1244_v11 }
 0x2ad   :  { %2254 = vmatmul.mubr.msk.bf16.vlgmr.msra.gmra.mxu0 %vm920_vm3, %v1210_v3 }
 0x2ae   :  { %1763 = vmatprep.mubr.bf16.mxu0 %v2386_v9 }
 0x2b4   :  { %v1412_v42 = vpop.permute.xlu0 %1411 }
 0x2d5   :  { %v1564_v46 = vpop.permute.xlu0 %1563 }
 0x345   :  { %v976_v16 = vpop.f32.mrf.mxu1 }
 0x347   :  { %v978_v15 = vpop.f32.mrf.mxu1 }
 0x349   :  { %v980_v17 = vpop.f32.mrf.mxu1 }
 0x34b   :  { %v981_v18 = vpop.f32.mrf.mxu1 }
 0x34d   :  { %v1017_v19 = vpop.f32.mrf.mxu1 }
 0x34f   :  { %v1019_v20 = vpop.f32.mrf.mxu1 }
 0x351   :  { %v1021_v21 = vpop.f32.mrf.mxu1  ;;  %v1058_v22 = vpop.f32.mrf.mxu0 }
 0x353   :  { %v1022_v23 = vpop.f32.mrf.mxu1  ;;  %v1060_v25 = vpop.f32.mrf.mxu0 }
 0x355   :  { %v1062_v26 = vpop.f32.mrf.mxu0  ;;  %v1120_v27 = vpop.f32.mrf.mxu1 }
 0x356   :  { %v1121_v41 = vadd.f32 %v1120_v27, %v976_v16 }
 0x357   :  { %v1063_v28 = vpop.f32.mrf.mxu0  ;;  %v1122_v30 = vpop.f32.mrf.mxu1 }
 0x358   :  { %v1123_v10 = vadd.f32 %v1122_v30, %v978_v15 }
 0x359   :  { %v1124_v31 = vpop.f32.mrf.mxu1  ;;  %v1161_v32 = vpop.f32.mrf.mxu0 }
 0x35a   :  { %v1162_v52 = vadd.f32 %v1161_v32, %v1017_v19  ;;  %v1446_v19 = vsub.s32 4, %v1429_v24 }
 0x35b   :  { %v1125_v35 = vpop.f32.mrf.mxu1  ;;  %v1163_v36 = vpop.f32.mrf.mxu0 }
 0x35c   :  { %v1164_v61 = vadd.f32 %v1163_v36, %v1019_v20  ;;  %v1450_v20 = vsub.s32 5, %v1429_v24  ;;  %v1447_v32 = vrot.slane %v1426_v50, %v1446_v19 }
 0x35d   :  { %v1165_v37 = vpop.f32.mrf.mxu0  ;;  %v1202_v38 = vpop.f32.mrf.mxu1 }
 0x35e   :  { %v1203_v12 = vadd.f32 %v1202_v38, %v1058_v22 }
 0x35f   :  { %v1166_v39 = vpop.f32.mrf.mxu0  ;;  %v1204_v40 = vpop.f32.mrf.mxu1 }
 0x360   :  { %v1205_v15 = vadd.f32 %v1204_v40, %v1060_v25  ;;  %v1451_v25 = vrot.slane %v1426_v50, %v1450_v20 }
 0x361   :  { %v1206_v44 = vpop.f32.mrf.mxu1  ;;  %v1313_v45 = vpop.f32.mrf.mxu0 }
 0x362   :  { %v1402_v48 = vadd.f32 %v1313_v45, %v1121_v41 }
 0x363   :  { %v1207_v51 = vpop.f32.mrf.mxu1  ;;  %v1315_v53 = vpop.f32.mrf.mxu0 }
 0x364   :  { %v1403_v54 = vadd.f32 %v1315_v53, %v1123_v10  ;;  %v1414_v55 = vadd.f32 %v1412_v42, %v1402_v48 }
 0x365   :  { %v1317_v49 = vpop.f32.mrf.mxu0  ;;  %v1354_v58 = vpop.f32.mrf.mxu1 }
 0x366   :  { %v1415_v13 = vadd.f32 %v1412_v42, %v1403_v54  ;;  %v1420_v62 = vmax.f32 %v1414_v55, 0.0  ;;  %v1404_v63 = vadd.f32 %v1354_v58, %v1162_v52 }
 0x367   :  { %v1318_v0 = vpop.f32.mrf.mxu0  ;;  %v1356_v1 = vpop.f32.mrf.mxu1 }
 0x368   :  { %v1421_v2 = vmax.f32 %v1415_v13, 0.0  ;;  %v1416_v3 = vadd.f32 %v1412_v42, %v1404_v63  ;;  %v1405_v29 = vadd.f32 %v1356_v1, %v1164_v61  ;;  %v1458_v5 = vmul.f32 %v1431_v56, %v1420_v62 }
 0x369   :  { %v1358_v43 = vpop.f32.mrf.mxu1 }
 0x36a   :  { %v1459_v6 = vmul.f32 %v1435_v57, %v1421_v2  ;;  %v1422_v7 = vmax.f32 %v1416_v3, 0.0  ;;  %v1417_v8 = vadd.f32 %v1412_v42, %v1405_v29  ;;  %v2381_v27 = vpack.c.bf16 %v1458_v5, %v1458_v5 }
 0x36b   :  { %v1359_v11 = vpop.f32.mrf.mxu1 }
 0x36c   :  { %v1423_v16 = vmax.f32 %v1417_v8, 0.0  ;;  %v1460_v17 = vmul.f32 %v1439_v4, %v1422_v7  ;;  %v2380_v26 = vpack.c.bf16 %v1459_v6, %v1459_v6  ;;  %1551 = vrot.lane.b32.xlu1 %v2381_v27, %s2403_s1  ;;  %v2155_v11 = vld [vmem:[%s3208_s6] sm:$0xff] }
 0x36d   :  { %v1395_v18 = vpop.f32.mrf.mxu0 }
 0x36e   :  { %v1461_v21 = vmul.f32 %v1443_v34, %v1423_v16  ;;  %v1406_v23 = vadd.f32 %v1395_v18, %v1203_v12  ;;  %1533 = vrot.lane.b32.xlu0 %v2380_v26, %s2392_s21  ;;  %v2973_v36 = vpack.c.bf16 %v1460_v17, %v1460_v17 }
 0x36f   :  { %v1397_v28 = vpop.f32.mrf.mxu0 }
 0x370   :  { %v1418_v30 = vadd.f32 %v1412_v42, %v1406_v23  ;;  %v1407_v31 = vadd.f32 %v1397_v28, %v1205_v15  ;;  %1553 = vrot.lane.b32.xlu1 %v2380_v26, %s2403_s1  ;;  %v2383_v40 = vpack.c.bf16 %v1461_v21, %v1461_v21 }
 0x371   :  { %v1399_v33 = vpop.f32.mrf.mxu0 }
 0x372   :  { %v1424_v22 = vmax.f32 %v1418_v30, 0.0  ;;  %v1419_v35 = vadd.f32 %v1412_v42, %v1407_v31  ;;  %1555 = vrot.lane.b32.xlu0 %v2973_v36, %s2403_s1  ;;  %v2988_v42 = vld [vmem:[%s3207_s5] sm:$0xf] }
 0x373   :  { %v1400_v37 = vpop.f32.mrf.mxu0  ;;  %v2271_v45 = vcombine.low %v2988_v42, %v2988_v42 }
 0x374   :  { %v1425_v38 = vmax.f32 %v1419_v35, 0.0  ;;  %v1462_v24 = vmul.f32 %v1447_v32, %v1424_v22  ;;  %1531 = vrot.lane.b32.xlu1 %v2381_v27, %s2392_s21 }
 0x376   :  { %v1463_v39 = vmul.f32 %v1451_v25, %v1425_v38  ;;  %1537 = vrot.lane.b32.xlu0 %v2383_v40, %s2392_s21  ;;  %v2980_v41 = vpack.c.bf16 %v1462_v24, %v1462_v24 }
 0x378   :  { %1557 = vrot.lane.b32.xlu1 %v2383_v40, %s2403_s1  ;;  %v2385_v44 = vpack.c.bf16 %v1463_v39, %v1463_v39 }
 0x37a   :  { %1559 = vrot.lane.b32.xlu0 %v2980_v41, %s2403_s1 }
 0x37c   :  { %1535 = vrot.lane.b32.xlu1 %v2973_v36, %s2392_s21 }
 0x37e   :  { %1541 = vrot.lane.b32.xlu0 %v2385_v44, %s2392_s21 }
 0x380   :  { %1561 = vrot.lane.b32.xlu1 %v2385_v44, %s2403_s1 }
 0x382   :  { %1614 = vrot.lane.b32.xlu0 %v2271_v45, %s2404_s19 }
 0x384   :  { %1539 = vrot.lane.b32.xlu1 %v2980_v41, %s2392_s21 }
 0x388   :  { %1543 = vrot.lane.b32.xlu1 %v2964_v14, %s2392_s21 }
 0x38c   :  { %1649 = vrot.lane.b32.xlu1 %v1564_v46, %s2405_s3 }
 0x3de   :  { %v1552_v47 = vpop.permute.xlu1 %1551 }
 0x3e0   :  { %v1534_v10 = vpop.permute.xlu0 %1533 }
 0x3e2   :  { %v1554_v48 = vpop.permute.xlu1 %1553 }
 0x3e3   :  { %v3003_v50 = vsel %vm814_vm5, %v1552_v47, %v1554_v48 }
 0x3e4   :  { %1973 = vrot.lane.b32.xlu1 %v3003_v50, %s2406_s28  ;;  %v1556_v51 = vpop.permute.xlu0 %1555 }
 0x3e5   :  { %v3014_v56 = vsel %vm814_vm5, %v1554_v48, %v1556_v51 }
 0x3e6   :  { %v1532_v53 = vpop.permute.xlu1 %1531 }
 0x3e7   :  { %v1545_v52 = vsel %vm392_vm14, %v1532_v53, %v1534_v10 }
 0x3e8   :  { %v3009_v54 = vsel %vm3241_vm7, %v2381_v27, %v1545_v52  ;;  %v1538_v57 = vpop.permute.xlu0 %1537  ;;  %vm3253_vm7 = vmmov %vm3226_vm0 }
 0x3e9   :  { %1623 = vrot.lane.b32.xlu1 %v3009_v54, %s2405_s3 }
 0x3ea   :  { %v1558_v55 = vpop.permute.xlu1 %1557 }
 0x3eb   :  { %v3030_v0 = vsel %vm814_vm5, %v1556_v51, %v1558_v55 }
 0x3ec   :  { %v1560_v58 = vpop.permute.xlu0 %1559 }
 0x3ed   :  { %1639 = vrot.lane.b32.xlu1 %v3014_v56, %s2405_s3  ;;  %v3054_v34 = vsel %vm814_vm5, %v1558_v55, %v1560_v58 }
 0x3ee   :  { %v1536_v49 = vpop.permute.xlu1 %1535 }
 0x3ef   :  { %v1546_v61 = vsel %vm392_vm14, %v1534_v10, %v1536_v49  ;;  %v1547_v5 = vsel %vm392_vm14, %v1536_v49, %v1538_v57 }
 0x3f0   :  { %v3025_v62 = vsel %vm3242_vm8, %v2380_v26, %v1546_v61  ;;  %v1542_v3 = vpop.permute.xlu0 %1541  ;;  %v3070_v6 = vsel %vm3246_vm15, %v2973_v36, %v1547_v5  ;;  %vm3254_vm8 = vmmov %vm3226_vm0 }
 0x3f1   :  { %vm3259_vm15 = vmmov %vm3226_vm0 }
 0x3f2   :  { %v1562_v60 = vpop.permute.xlu1 %1561 }
 0x3f3   :  { %v3019_v59 = vsel %vm814_vm5, %v1560_v58, %v1562_v60  ;;  %v3061_v43 = vsel %vm814_vm5, %v1562_v60, %v1564_v46  ;;  %vm3247_vm5 = vmmov %vm3226_vm0 }
 0x3f4   :  { %1645 = vrot.lane.b32.xlu1 %v3019_v59, %s2405_s3  ;;  %v1615_v19 = vpop.permute.xlu0 %1614 }
 0x3f6   :  { %v1540_v13 = vpop.permute.xlu1 %1539 }
 0x3f7   :  { %v1548_v2 = vsel %vm392_vm14, %v1538_v57, %v1540_v13  ;;  %v1549_v7 = vsel %vm392_vm14, %v1540_v13, %v1542_v3 }
 0x3f8   :  { %1625 = vrot.lane.b32.xlu1 %v3025_v62, %s2405_s3  ;;  %v3039_v29 = vsel %vm3244_vm11, %v2383_v40, %v1548_v2  ;;  %v3082_v8 = vsel %vm3247_vm5, %v2980_v41, %v1549_v7  ;;  %vm3257_vm11 = vmmov %vm3226_vm0 }
 0x3f9   :  { %vm3260_vm5 = vmmov %vm3226_vm0 }
 0x3fa   :  { %v1544_v63 = vpop.permute.xlu1 %1543 }
 0x3fb   :  { %v1610_v1 = vsel %vm3243_vm9, %v2964_v14, %v1544_v63  ;;  %v1550_v4 = vsel %vm392_vm14, %v1542_v3, %v1544_v63  ;;  %vm3248_vm14 = vmmov %vm3226_vm0 }
 0x3fc   :  { %1977 = vrot.lane.b32.xlu1 %v3030_v0, %s2406_s28  ;;  %1635 = vrot.lane.b32.xlu0 %v1610_v1, %s2405_s3  ;;  %v3047_v14 = vsel %vm3245_vm13, %v2385_v44, %v1550_v4  ;;  %vm3255_vm9 = vmmov %vm3226_vm0 }
 0x3fd   :  { %v1817_v49 = vsel %vm3255_vm9, %v3003_v50, 0  ;;  %vm3258_vm13 = vmmov %vm3226_vm0 }
 0x3fe   :  { %v1650_v12 = vpop.permute.xlu1 %1649 }
 0x400   :  { %1629 = vrot.lane.b32.xlu1 %v3039_v29, %s2405_s3  ;;  %1637 = vrot.lane.b32.xlu0 %v3003_v50, %s2405_s3 }
 0x404   :  { %1641 = vrot.lane.b32.xlu0 %v3030_v0, %s2405_s3  ;;  %1633 = vrot.lane.b32.xlu1 %v3047_v14, %s2405_s3 }
 0x408   :  { %1643 = vrot.lane.b32.xlu0 %v3054_v34, %s2405_s3  ;;  %1979 = vrot.lane.b32.xlu1 %v3054_v34, %s2406_s28 }
 0x40c   :  { %1647 = vrot.lane.b32.xlu0 %v3061_v43, %s2405_s3  ;;  %1983 = vrot.lane.b32.xlu1 %v3061_v43, %s2406_s28 }
 0x410   :  { %1627 = vrot.lane.b32.xlu0 %v3070_v6, %s2405_s3  ;;  %1957 = vrot.lane.b32.xlu1 %v2271_v45, %s2407_s0 }
 0x414   :  { %1975 = vrot.lane.b32.xlu0 %v3014_v56, %s2406_s28  ;;  %1963 = vrot.lane.b32.xlu1 %v3070_v6, %s2406_s28 }
 0x418   :  { %1631 = vrot.lane.b32.xlu0 %v3082_v8, %s2405_s3  ;;  %1967 = vrot.lane.b32.xlu1 %v3082_v8, %s2406_s28 }
 0x41c   :  { %1959 = vrot.lane.b32.xlu0 %v3009_v54, %s2406_s28  ;;  %1971 = vrot.lane.b32.xlu1 %v1610_v1, %s2406_s28 }
 0x420   :  { %1981 = vrot.lane.b32.xlu0 %v3019_v59, %s2406_s28 }
 0x424   :  { %1985 = vrot.lane.b32.xlu0 %v1564_v46, %s2406_s28 }
 0x428   :  { %1961 = vrot.lane.b32.xlu0 %v3025_v62, %s2406_s28 }
 0x42c   :  { %1965 = vrot.lane.b32.xlu0 %v3039_v29, %s2406_s28 }
 0x430   :  { %1969 = vrot.lane.b32.xlu0 %v3047_v14, %s2406_s28 }
 0x434   :  { %2158 = vperm.xlu0 %2370, %v2155_v11  }
 0x456   :  { %v3103_v16 = vpop.permute.xlu1 %1973 }
 0x45b   :  { %v1624_v15 = vpop.permute.xlu1 %1623 }
 0x45f   :  { %v1640_v17 = vpop.permute.xlu1 %1639 }
 0x466   :  { %v1646_v18 = vpop.permute.xlu1 %1645 }
 0x46a   :  { %v1626_v20 = vpop.permute.xlu1 %1625 }
 0x46b   :  { %v1651_v39 = vsel %vm901_vm12, %v1624_v15, %v1626_v20 }
 0x46e   :  { %v1636_v21 = vpop.permute.xlu0 %1635  ;;  %v3105_v23 = vpop.permute.xlu1 %1977 }
 0x472   :  { %v1638_v26 = vpop.permute.xlu0 %1637  ;;  %v1630_v32 = vpop.permute.xlu1 %1629 }
 0x473   :  { %v1657_v27 = vsel %vm901_vm12, %v1638_v26, %v1640_v17 }
 0x474   :  { %v1673_v31 = vsel %vm3248_vm14, %v1657_v27, 0  ;;  %vm3261_vm14 = vmmov %vm3226_vm0 }
 0x476   :  { %v1642_v28 = vpop.permute.xlu0 %1641  ;;  %v1634_v36 = vpop.permute.xlu1 %1633 }
 0x477   :  { %v1658_v30 = vsel %vm901_vm12, %v1640_v17, %v1642_v28  ;;  %v1656_v47 = vsel %vm901_vm12, %v1634_v36, %v1636_v21 }
 0x478   :  { %2272 = vmatprep.subr.msk.bf16.mxu1 %vm3226_vm0, %v1658_v30 }
 0x479   :  { %1703 = vmatpush1.bf16.msra.mxu1 %v1673_v31 }
 0x47a   :  { %v1644_v33 = vpop.permute.xlu0 %1643  ;;  %v1980_v40 = vpop.permute.xlu1 %1979 }
 0x47b   :  { %v1659_v22 = vsel %vm901_vm12, %v1642_v28, %v1644_v33  ;;  %v1660_v35 = vsel %vm901_vm12, %v1644_v33, %v1646_v18  ;;  %v1995_v2 = vsel %vm1239_vm10, %v3105_v23, %v1980_v40 }
 0x47c   :  { %v1679_v25 = vsel %vm3249_vm2, %v1659_v22, 0  ;;  %2274 = vmatprep.subr.msk.bf16.mxu0 %vm3250_vm4, %v1660_v35  ;;  %vm3262_vm2 = vmmov %vm3226_vm0 }
 0x47d   :  { %1744 = vmatpush1.bf16.msra.mxu0 %v1679_v25  ;;  %vm3263_vm4 = vmmov %vm3226_vm0 }
 0x47e   :  { %v1648_v37 = vpop.permute.xlu0 %1647  ;;  %v1984_v10 = vpop.permute.xlu1 %1983 }
 0x47f   :  { %v1661_v41 = vsel %vm901_vm12, %v1646_v18, %v1648_v37  ;;  %v1662_v44 = vsel %vm901_vm12, %v1648_v37, %v1650_v12 }
 0x480   :  { %v1685_v46 = vsel %vm3252_vm6, %v1661_v41, 0 }
 0x482   :  { %v1628_v38 = vpop.permute.xlu0 %1627  ;;  %v1958_v57 = vpop.permute.xlu1 %1957 }
 0x483   :  { %v1652_v24 = vsel %vm901_vm12, %v1626_v20, %v1628_v38  ;;  %v1653_v52 = vsel %vm901_vm12, %v1628_v38, %v1630_v32 }
 0x484   :  { %1704 = vmatprep.subr.bf16.mxu1 %v1652_v24 }
 0x485   :  { %1705 = vmatpush1.bf16.msra.mxu1 %v1651_v39 }
 0x486   :  { %v1976_v45 = vpop.permute.xlu0 %1975  ;;  %2276 = vmatprep.subr.msk.bf16.mxu1 %vm3251_vm1, %v1662_v44  ;;  %v1964_v61 = vpop.permute.xlu1 %1963 }
 0x487   :  { %v1994_v50 = vsel %vm1239_vm10, %v1976_v45, %v3105_v23 }
 0x488   :  { %2273 = vmatmul.mubr.msk.bf16.vlgmr.msra.gmra.mxu1 %vm920_vm3, %v1615_v19 }
 0x489   :  { %1785 = vmatpush1.bf16.msra.mxu1 %v1685_v46  ;;  %1804 = vmatprep.mubr.bf16.mxu1 %v2386_v9 }
 0x48a   :  { %v1632_v48 = vpop.permute.xlu0 %1631  ;;  %1786 = vmatprep.subr.bf16.mxu1 %v1656_v47  ;;  %v1968_v3 = vpop.permute.xlu1 %1967 }
 0x48b   :  { %v1655_v51 = vsel %vm901_vm12, %v1632_v48, %v1634_v36  ;;  %v1654_v53 = vsel %vm901_vm12, %v1630_v32, %v1632_v48  ;;  %vm3256_vm12 = vmmov %vm3226_vm0 }
 0x48c   :  { %1745 = vmatprep.subr.bf16.mxu0 %v1654_v53  ;;  %v1823_v58 = vsel %vm3256_vm12, %v3030_v0, 0 }
 0x48d   :  { %1746 = vmatpush1.bf16.msra.mxu0 %v1653_v52  ;;  %1787 = vmatpush1.bf16.msra.mxu1 %v1655_v51 }
 0x48e   :  { %v1960_v55 = vpop.permute.xlu0 %1959  ;;  %2278 = vmatprep.subr.msk.bf16.mxu0 %vm3253_vm7, %v3014_v56  ;;  %2280 = vmatprep.subr.msk.bf16.mxu1 %vm3254_vm8, %v3054_v34  ;;  %v1993_v56 = vsel %vm1239_vm10, %v3103_v16, %v1976_v45  ;;  %v2015_v34 = vsel %vm3262_vm2, %v1995_v2, 0 }
 0x490   :  { %2275 = vmatmul.mubr.msk.bf16.vlgmr.msra.gmra.mxu0 %vm920_vm3, %v1615_v19  ;;  %2277 = vmatmul.mubr.msk.bf16.vlgmr.msra.gmra.mxu1 %vm920_vm3, %v1615_v19 }
 0x491   :  { %1847 = vmatpush1.bf16.msra.mxu0 %v1817_v49  ;;  %1888 = vmatpush1.bf16.msra.mxu1 %v1823_v58 }
 0x492   :  { %v1982_v60 = vpop.permute.xlu0 %1981  ;;  %1848 = vmatprep.subr.bf16.mxu0 %v3025_v62  ;;  %1889 = vmatprep.subr.bf16.mxu1 %v3039_v29  ;;  %v2009_v62 = vsel %vm3259_vm15, %v1993_v56, 0 }
 0x493   :  { %1866 = vmatprep.mubr.bf16.mxu0 %v2386_v9  ;;  %1907 = vmatprep.mubr.bf16.mxu1 %v2386_v9  ;;  %v1997_v29 = vsel %vm1239_vm10, %v1982_v60, %v1984_v10 }
 0x495   :  { %1849 = vmatpush1.bf16.msra.mxu0 %v3009_v54  ;;  %1890 = vmatpush1.bf16.msra.mxu1 %v3070_v6  ;;  %v1829_v54 = vsel %vm3260_vm5, %v3019_v59, 0  ;;  %v1996_v59 = vsel %vm1239_vm10, %v1980_v40, %v1982_v60  ;;  %v1972_v6 = vpop.permute.xlu1 %1971 }
 0x496   :  { %v1986_v13 = vpop.permute.xlu0 %1985  ;;  %2282 = vmatprep.subr.msk.bf16.mxu0 %vm3257_vm11, %v3061_v43  ;;  %2284 = vmatprep.subr.msk.bf16.mxu1 %vm3258_vm13, %v1994_v50  ;;  %v2021_v43 = vsel %vm3263_vm4, %v1997_v29, 0 }
 0x497   :  { %v1998_v4 = vsel %vm1239_vm10, %v1984_v10, %v1986_v13 }
 0x498   :  { %2279 = vmatmul.mubr.msk.bf16.vlgmr.msra.gmra.mxu0 %vm920_vm3, %v2988_v42  ;;  %2281 = vmatmul.mubr.msk.bf16.vlgmr.msra.gmra.mxu1 %vm920_vm3, %v2988_v42 }
 0x499   :  { %1929 = vmatpush1.bf16.msra.mxu0 %v1829_v54  ;;  %2039 = vmatpush1.bf16.msra.mxu1 %v2009_v62 }
 0x49a   :  { %v1962_v63 = vpop.permute.xlu0 %1961  ;;  %1930 = vmatprep.subr.bf16.mxu0 %v3047_v14  ;;  %1948 = vmatprep.mubr.bf16.mxu0 %v2386_v9 }
 0x49b   :  { %v1987_v0 = vsel %vm1239_vm10, %v1960_v55, %v1962_v63  ;;  %v1988_v1 = vsel %vm1239_vm10, %v1962_v63, %v1964_v61  ;;  %2058 = vmatprep.mubr.bf16.mxu1 %v2386_v9 }
 0x49c   :  { %2040 = vmatprep.subr.bf16.mxu1 %v1988_v1 }
 0x49d   :  { %1931 = vmatpush1.bf16.msra.mxu0 %v3082_v8  ;;  %2041 = vmatpush1.bf16.msra.mxu1 %v1987_v0 }
 0x49e   :  { %v1966_v14 = vpop.permute.xlu0 %1965  ;;  %2286 = vmatprep.subr.msk.bf16.mxu0 %vm3261_vm14, %v1996_v59  ;;  %2288 = vmatprep.subr.msk.bf16.mxu1 %vm3226_vm0, %v1998_v4 }
 0x49f   :  { %v1990_v5 = vsel %vm1239_vm10, %v1966_v14, %v1968_v3  ;;  %v1989_v12 = vsel %vm1239_vm10, %v1964_v61, %v1966_v14 }
 0x4a0   :  { %2283 = vmatmul.mubr.msk.bf16.vlgmr.msra.gmra.mxu0 %vm920_vm3, %v2988_v42  ;;  %2285 = vmatmul.mubr.msk.bf16.vlgmr.msra.gmra.mxu1 %vm920_vm3, %v1958_v57 }
 0x4a1   :  { %2080 = vmatpush1.bf16.msra.mxu0 %v2015_v34  ;;  %2121 = vmatpush1.bf16.msra.mxu1 %v2021_v43 }
 0x4a2   :  { %v1970_v7 = vpop.permute.xlu0 %1969  ;;  %2081 = vmatprep.subr.bf16.mxu0 %v1990_v5  ;;  %2099 = vmatprep.mubr.bf16.mxu0 %v2386_v9 }
 0x4a3   :  { %v1991_v8 = vsel %vm1239_vm10, %v1968_v3, %v1970_v7  ;;  %v1992_v11 = vsel %vm1239_vm10, %v1970_v7, %v1972_v6  ;;  %2140 = vmatprep.mubr.bf16.mxu1 %v2386_v9 }
 0x4a4   :  { %2122 = vmatprep.subr.bf16.mxu1 %v1992_v11 }
 0x4a5   :  { %2082 = vmatpush1.bf16.msra.mxu0 %v1989_v12  ;;  %2123 = vmatpush1.bf16.msra.mxu1 %v1991_v8 }
 0x4a8   :  { %2287 = vmatmul.mubr.msk.bf16.vlgmr.msra.gmra.mxu0 %vm920_vm3, %v1958_v57  ;;  %2289 = vmatmul.mubr.msk.bf16.vlgmr.msra.gmra.mxu1 %vm920_vm3, %v1958_v57 }
 0x4af   :  { %v2159_v24 = vpop.permute.xlu0 %2158 }
 0x548   :  { %v1724_v42 = vpop.f32.mrf.mxu1 }
 0x54a   :  { %v1726_v16 = vpop.f32.mrf.mxu1 }
 0x54c   :  { %v1728_v15 = vpop.f32.mrf.mxu1 }
 0x54e   :  { %v1729_v17 = vpop.f32.mrf.mxu1 }
 0x550   :  { %v1765_v18 = vpop.f32.mrf.mxu0  ;;  %v1806_v19 = vpop.f32.mrf.mxu1 }
 0x552   :  { %v1767_v20 = vpop.f32.mrf.mxu0  ;;  %v1808_v21 = vpop.f32.mrf.mxu1 }
 0x554   :  { %v1769_v23 = vpop.f32.mrf.mxu0  ;;  %v1810_v26 = vpop.f32.mrf.mxu1 }
 0x556   :  { %v1770_v9 = vpop.f32.mrf.mxu0  ;;  %v1811_v27 = vpop.f32.mrf.mxu1 }
 0x558   :  { %v1868_v28 = vpop.f32.mrf.mxu0  ;;  %v1909_v30 = vpop.f32.mrf.mxu1 }
 0x559   :  { %v1869_v36 = vadd.f32 %v1868_v28, %v1724_v42  ;;  %v1910_v55 = vadd.f32 %v1909_v30, %v1765_v18 }
 0x55a   :  { %v1870_v31 = vpop.f32.mrf.mxu0  ;;  %v1911_v32 = vpop.f32.mrf.mxu1 }
 0x55b   :  { %v1871_v39 = vadd.f32 %v1870_v31, %v1726_v16  ;;  %v1912_v56 = vadd.f32 %v1911_v32, %v1767_v20 }
 0x55c   :  { %v1872_v33 = vpop.f32.mrf.mxu0  ;;  %v1913_v22 = vpop.f32.mrf.mxu1 }
 0x55e   :  { %v1873_v35 = vpop.f32.mrf.mxu0  ;;  %v1914_v25 = vpop.f32.mrf.mxu1 }
 0x560   :  { %v1950_v37 = vpop.f32.mrf.mxu0  ;;  %v2060_v38 = vpop.f32.mrf.mxu1 }
 0x561   :  { %v2149_v40 = vadd.f32 %v2060_v38, %v1869_v36  ;;  %v1951_v57 = vadd.f32 %v1950_v37, %v1806_v19 }
 0x562   :  { %v1952_v41 = vpop.f32.mrf.mxu0  ;;  %v2062_v44 = vpop.f32.mrf.mxu1 }
 0x563   :  { %v2161_v45 = vadd.f32 %v2159_v24, %v2149_v40  ;;  %v2150_v46 = vadd.f32 %v2062_v44, %v1871_v39  ;;  %v1953_v50 = vadd.f32 %v1952_v41, %v1808_v21 }
 0x564   :  { %v1954_v47 = vpop.f32.mrf.mxu0  ;;  %v2064_v10 = vpop.f32.mrf.mxu1 }
 0x565   :  { %v2167_v48 = vmax.f32 %v2161_v45, 0.0  ;;  %v2162_v51 = vadd.f32 %v2159_v24, %v2150_v46 }
 0x566   :  { %v1955_v53 = vpop.f32.mrf.mxu0  ;;  %v2065_v52 = vpop.f32.mrf.mxu1 }
 0x567   :  { %2173 = vst [vmem:[%s3209_s8] sm:$0xff] %v2167_v48  ;;  %v2168_v49 = vmax.f32 %v2162_v51, 0.0 }
 0x568   :  { %v2101_v58 = vpop.f32.mrf.mxu0  ;;  %v2142_v60 = vpop.f32.mrf.mxu1 }
 0x569   :  { %2174 = vst [vmem:[%s3209_s8 + $0x8] sm:$0xff] %v2168_v49  ;;  %v2151_v61 = vadd.f32 %v2101_v58, %v1910_v55  ;;  %v2153_v13 = vadd.f32 %v2142_v60, %v1951_v57 }
 0x56a   :  { %v2103_v62 = vpop.f32.mrf.mxu0  ;;  %v2144_v54 = vpop.f32.mrf.mxu1 }
 0x56b   :  { %v2163_v63 = vadd.f32 %v2159_v24, %v2151_v61  ;;  %v2165_v0 = vadd.f32 %v2159_v24, %v2153_v13  ;;  %v2152_v1 = vadd.f32 %v2103_v62, %v1912_v56  ;;  %v2154_v2 = vadd.f32 %v2144_v54, %v1953_v50 }
 0x56c   :  { %v2105_v3 = vpop.f32.mrf.mxu0  ;;  %v2146_v59 = vpop.f32.mrf.mxu1 }
 0x56d   :  { %v2169_v29 = vmax.f32 %v2163_v63, 0.0  ;;  %v2171_v4 = vmax.f32 %v2165_v0, 0.0  ;;  %v2164_v14 = vadd.f32 %v2159_v24, %v2152_v1  ;;  %v2166_v34 = vadd.f32 %v2159_v24, %v2154_v2 }
 0x56e   :  { %v2106_v43 = vpop.f32.mrf.mxu0  ;;  %v2147_v5 = vpop.f32.mrf.mxu1 }
 0x56f   :  { %2175 = vst [vmem:[%s3209_s8 + $0x10] sm:$0xff] %v2169_v29  ;;  %2177 = vst [vmem:[%s3209_s8 + $0x20] sm:$0xff] %v2171_v4  ;;  %v2170_v6 = vmax.f32 %v2164_v14, 0.0  ;;  %v2172_v7 = vmax.f32 %v2166_v34, 0.0 }
 0x571   :  { %2176 = vst [vmem:[%s3209_s8 + $0x18] sm:$0xff] %v2170_v6  ;;  %2178 = vst [vmem:[%s3209_s8 + $0x28] sm:$0xff] %v2172_v7 }

</bundles_post_ra>
